<compile_context>
chip_gen: v7x
topology: tpu7x:2x2x1
jax: 0.10.0
libtpu: 0.0.40
codegen_flags: <defaults>
</compile_context>

<pallas_src>
import functools

import jax
import jax.numpy as jnp
from jax.experimental import pallas as pl
from jax.experimental.pallas import tpu as pltpu


# ----------------------------- chip-aware config ----------------------------


def _vmem_capacity_bytes():
    try:
        return int(pltpu.get_tpu_info().vmem_capacity_bytes)
    except Exception:
        return 64 * 1024 * 1024                       # conservative (v7x-sized) fallback


_VMEM_CAP = _vmem_capacity_bytes()
_VMEM_LIMIT = int(min(_VMEM_CAP * 5 // 8, 96 * 1024 * 1024))   # ~40 MiB v7x, 80 MiB v5e/v6e
_TQ_TARGET = 128 if _VMEM_CAP <= 64 * 1024 * 1024 else 256     # v7x -> 128, v5e/v6e -> 256

# single-buffer grid-invariant operands (weights / biases / LN params)
_SINGLE_BUF = {"pipeline_mode": pl.Buffered(1)} if hasattr(pl, "Buffered") else {}


def _pick_q_tile(S, target):
    """Largest divisor of S that is <= target and a multiple of 8 (or == S)."""
    if S <= target:
        return S
    for t in range(min(target, S), 0, -1):
        if S % t == 0 and (t % 8 == 0 or t == S):
            return t
    return S


def _const_spec(x):
    """Full-array BlockSpec for a grid-invariant operand (single-buffered)."""
    nd = x.ndim
    return pl.BlockSpec(x.shape, lambda b, i: (0,) * nd, **_SINGLE_BUF)


# ----------------------------- Pallas kernels --------------------------------


def _layernorm(x, g, b, eps):
    m = jnp.mean(x, axis=-1, keepdims=True)
    v = jnp.mean((x - m) ** 2, axis=-1, keepdims=True)
    return (x - m) * jax.lax.rsqrt(v + eps) * g + b


def qkv_kernel(h_ref, ln1_g, ln1_b, wqkv, bqkv, q_ref, k_ref, v_ref, *, n_head, eps):
    """LN1 + QKV projection for one (batch, row-tile); emits head-major bf16 q/k/v."""
    h = h_ref[0]                                       # (T, D) f32
    T, D = h.shape
    H = n_head
    hd = D // H

    x = _layernorm(h, ln1_g[...], ln1_b[...], eps)                        # f32
    qkv = jnp.dot(x.astype(jnp.bfloat16), wqkv[...],                      # bf16 MXU, f32 acc
                  preferred_element_type=jnp.float32) + bqkv[...]         # (T, 3D)

    scale = 1.0 / float(hd) ** 0.5
    q = (qkv[:, :D] * scale).astype(jnp.bfloat16)      # scale folded into q (f32, then cast)
    k = qkv[:, D:2 * D].astype(jnp.bfloat16)
    v = qkv[:, 2 * D:].astype(jnp.bfloat16)

    # head-major layout (H, T, hd): transpose done once per row-tile (bf16), so the
    # attention kernel never relayouts K/V per q-tile.
    q_ref[0] = jnp.swapaxes(q.reshape(T, H, hd), 0, 1)
    k_ref[0] = jnp.swapaxes(k.reshape(T, H, hd), 0, 1)
    v_ref[0] = jnp.swapaxes(v.reshape(T, H, hd), 0, 1)


def attn_mlp_kernel(h_ref, q_ref, k_ref, v_ref, mask_ref,
                    wproj, bproj, ln2_g, ln2_b, wfc, bfc, wfc2, bfc2,
                    *rest, eps, fuse_lnf):
    """Attention (q-tile vs full K/V) + proj + residual + LN2 + MLP + residual [+ ln_f]."""
    if fuse_lnf:
        lnf_g, lnf_b, out_ref = rest
    else:
        (out_ref,) = rest

    h = h_ref[0]                                       # (TQ, D) f32  (residual stream)
    q = q_ref[0]                                       # (H, TQ, hd) bf16, pre-scaled
    k = k_ref[0]                                       # (H, S,  hd) bf16
    v = v_ref[0]                                       # (H, S,  hd) bf16
    TQ, D = h.shape

    # ---------------- attention ----------------
    s = jnp.einsum('hqd,hkd->hqk', q, k,
                   preferred_element_type=jnp.float32)                    # (H, TQ, S) f32
    s = s + mask_ref[...][None, :, :]                  # causal + calibrated additive mask
    s = s - jnp.max(s, axis=-1, keepdims=True)
    p = jnp.exp(s)
    p = p * pl.reciprocal(jnp.sum(p, axis=-1, keepdims=True), approx=True)
    o = jnp.einsum('hqk,hkd->hqd', p.astype(jnp.bfloat16), v,
                   preferred_element_type=jnp.float32)                    # (H, TQ, hd) f32

    attn = jnp.swapaxes(o.astype(jnp.bfloat16), 0, 1).reshape(TQ, D)      # (TQ, D) bf16
    attn = jnp.dot(attn, wproj[...], preferred_element_type=jnp.float32) + bproj[...]
    h = h + attn

    # ---------------- MLP (gelu_new) ----------------
    x2 = _layernorm(h, ln2_g[...], ln2_b[...], eps)
    u = jnp.dot(x2.astype(jnp.bfloat16), wfc[...],
                preferred_element_type=jnp.float32) + bfc[...]            # (TQ, 4D) f32
    c0 = jnp.float32(0.7978845608028654)               # sqrt(2/pi)
    c1 = jnp.float32(0.7978845608028654 * 0.044715)
    u2 = u * u
    u = 0.5 * u * (1.0 + jnp.tanh(u * (c0 + c1 * u2)))
    y = jnp.dot(u.astype(jnp.bfloat16), wfc2[...],
                preferred_element_type=jnp.float32) + bfc2[...]
    h = h + y

    if fuse_lnf:
        h = _layernorm(h, lnf_g[...], lnf_b[...], eps)

    out_ref[0] = h


# ----------------------------- wrappers ------------------------------------


def gpt2_block(h, add_mask, p, n_head, lnf_params=None):
    B, S, D = h.shape
    H = n_head
    hd = D // H
    TQ = _pick_q_tile(S, _TQ_TARGET)
    grid = (B, S // TQ)
    cparams = pltpu.CompilerParams(
        dimension_semantics=("parallel", "parallel"),
        vmem_limit_bytes=_VMEM_LIMIT)

    # ---- pass 1: LN1 + QKV projection (row-tiled) ----
    qkv_fn = functools.partial(qkv_kernel, n_head=H, eps=1e-5)
    qkv_out = pl.pallas_call(
        qkv_fn,
        out_shape=[jax.ShapeDtypeStruct((B, H, S, hd), jnp.bfloat16)] * 3,
        grid=grid,
        in_specs=[pl.BlockSpec((1, TQ, D), lambda b, i: (b, i, 0)),
                  _const_spec(p["ln1_g"]), _const_spec(p["ln1_b"]),
                  _const_spec(p["wqkv"]), _const_spec(p["bqkv"])],
        out_specs=[pl.BlockSpec((1, H, TQ, hd), lambda b, i: (b, 0, i, 0))] * 3,
        compiler_params=cparams,
    )(h, p["ln1_g"], p["ln1_b"], p["wqkv"], p["bqkv"])
    q, k, v = qkv_out

    # ---- pass 2: attention (q-tile vs full K/V) + MLP (+ ln_f on last block) ----
    fuse = lnf_params is not None
    attn_fn = functools.partial(attn_mlp_kernel, eps=1e-5, fuse_lnf=fuse)
    inputs = [h, q, k, v, add_mask,
              p["wproj"], p["bproj"], p["ln2_g"], p["ln2_b"],
              p["wfc"], p["bfc"], p["wfc2"], p["bfc2"]]
    in_specs = [pl.BlockSpec((1, TQ, D), lambda b, i: (b, i, 0)),
                pl.BlockSpec((1, H, TQ, hd), lambda b, i: (b, 0, i, 0)),
                pl.BlockSpec((1, H, S, hd), lambda b, i: (b, 0, 0, 0)),   # full K; re-DMA'd
                pl.BlockSpec((1, H, S, hd), lambda b, i: (b, 0, 0, 0)),   # only when b changes
                pl.BlockSpec((TQ, S), lambda b, i: (i, 0)),
                _const_spec(p["wproj"]), _const_spec(p["bproj"]),
                _const_spec(p["ln2_g"]), _const_spec(p["ln2_b"]),
                _const_spec(p["wfc"]), _const_spec(p["bfc"]),
                _const_spec(p["wfc2"]), _const_spec(p["bfc2"])]
    if fuse:
        inputs += list(lnf_params)
        in_specs += [_const_spec(x) for x in lnf_params]

    return pl.pallas_call(
        attn_fn,
        out_shape=jax.ShapeDtypeStruct((B, S, D), jnp.float32),
        grid=grid,
        in_specs=in_specs,
        out_specs=pl.BlockSpec((1, TQ, D), lambda b, i: (b, i, 0)),
        compiler_params=cparams,
    )(*inputs)


def msk_forward(token_ids, calibrated_mask, wte, wpe, blocks, lnf_g, lnf_b, n_head):
    B, S = token_ids.shape
    # wte(x) + wpe(arange(S))  (embedding gather is glue, not the hot path)
    h = jnp.take(wte, token_ids, axis=0) + wpe[:S][None, :, :]
    # Combine causal mask and calibrated additive mask ONCE (safe -1e30 instead of
    # finfo.min + mask); every head / layer / q-tile reuses slices of this (S, S) tensor.
    causal = jnp.tril(jnp.ones((S, S), dtype=bool))
    add_mask = jnp.where(causal, calibrated_mask.astype(jnp.float32), jnp.float32(-1e30))
    n_blocks = len(blocks)
    for i, p in enumerate(blocks):
        lnf = (lnf_g, lnf_b) if i == n_blocks - 1 else None
        h = gpt2_block(h, add_mask, p, n_head, lnf_params=lnf)
    # torch .view((-1,) + input_shape[1:] + (D,)) -> (B, S, D): already that shape.
    return h


# ----------------------------- parameters ----------------------------------


def init_params(key, D, L, V, P):
    """Random GPT-2-style params; big GEMM weights stored bf16 in HBM (cast ONCE here)."""
    keys = jax.random.split(key, 2 + L)
    wte = 0.02 * jax.random.normal(keys[0], (V, D), jnp.float32)
    wpe = 0.01 * jax.random.normal(keys[1], (P, D), jnp.float32)
    blocks = []
    for l in range(L):
        ks = jax.random.split(keys[2 + l], 4)
        blocks.append(dict(
            ln1_g=jnp.ones((1, D), jnp.float32), ln1_b=jnp.zeros((1, D), jnp.float32),
            wqkv=(0.02 * jax.random.normal(ks[0], (D, 3 * D), jnp.float32)).astype(jnp.bfloat16),
            bqkv=jnp.zeros((1, 3 * D), jnp.float32),
            wproj=(0.02 * jax.random.normal(ks[1], (D, D), jnp.float32)).astype(jnp.bfloat16),
            bproj=jnp.zeros((1, D), jnp.float32),
            ln2_g=jnp.ones((1, D), jnp.float32), ln2_b=jnp.zeros((1, D), jnp.float32),
            wfc=(0.02 * jax.random.normal(ks[2], (D, 4 * D), jnp.float32)).astype(jnp.bfloat16),
            bfc=jnp.zeros((1, 4 * D), jnp.float32),
            wfc2=(0.02 * jax.random.normal(ks[3], (4 * D, D), jnp.float32)).astype(jnp.bfloat16),
            bfc2=jnp.zeros((1, D), jnp.float32),
        ))
    lnf_g = jnp.ones((1, D), jnp.float32)
    lnf_b = jnp.zeros((1, D), jnp.float32)
    return wte, wpe, blocks, lnf_g, lnf_b


if __name__ == "__main__":
    # small GPT2-like config consistent with the module: l_layer=6 blocks
    B, S, D, H, L, V, P = 2, 8, 32, 4, 6, 64, 16

    key = jax.random.PRNGKey(0)
    k_ids, k_mask, k_par = jax.random.split(key, 3)

    # x in the torch forward is passed to wte(), i.e. it is a LongTensor of token ids.
    token_ids = jax.random.randint(k_ids, (B, S), 0, V, dtype=jnp.int32)
    calibrated_mask = 0.1 * jax.random.normal(k_mask, (S, S), jnp.float32)

    wte, wpe, blocks, lnf_g, lnf_b = init_params(k_par, D, L, V, P)

    fwd = jax.jit(functools.partial(msk_forward, n_head=H))
    out = fwd(token_ids, calibrated_mask, wte, wpe, blocks, lnf_g, lnf_b)
    jax.block_until_ready(out)

    assert out.shape == (B, S, D), out.shape
    assert out.dtype == jnp.float32
    print("KERNEL_OK")
</pallas_src>

<mosaic_0001>
module attributes {stable_mosaic.version = 11 : i64} {
  func.func @qkv_kernel(%arg0: i32, %arg1: i32, %arg2: memref<1x8x32xf32, #tpu.memory_space<vmem>>, %arg3: memref<1x32xf32, #tpu.memory_space<vmem>>, %arg4: memref<1x32xf32, #tpu.memory_space<vmem>>, %arg5: memref<32x96xbf16, #tpu.memory_space<vmem>>, %arg6: memref<1x96xf32, #tpu.memory_space<vmem>>, %arg7: memref<1x4x8x8xbf16, #tpu.memory_space<vmem>>, %arg8: memref<1x4x8x8xbf16, #tpu.memory_space<vmem>>, %arg9: memref<1x4x8x8xbf16, #tpu.memory_space<vmem>>) attributes {dimension_semantics = [#tpu.dimension_semantics<parallel>, #tpu.dimension_semantics<parallel>], iteration_bounds = array<i64: 2, 1>, scalar_prefetch = 0 : i64, scratch_operands = 0 : i64, tpu.core_type = #tpu.core_type<tc>, window_params = [{transform_indices = @transform_0, window_bounds = array<i64: 1, 8, 32>}, {pipeline_mode = #tpu.pipeline_mode<synchronous>, transform_indices = @transform_1, window_bounds = array<i64: 1, 32>}, {pipeline_mode = #tpu.pipeline_mode<synchronous>, transform_indices = @transform_2, window_bounds = array<i64: 1, 32>}, {pipeline_mode = #tpu.pipeline_mode<synchronous>, transform_indices = @transform_3, window_bounds = array<i64: 32, 96>}, {pipeline_mode = #tpu.pipeline_mode<synchronous>, transform_indices = @transform_4, window_bounds = array<i64: 1, 96>}, {transform_indices = @transform_5, window_bounds = array<i64: 1, 4, 8, 8>}, {transform_indices = @transform_6, window_bounds = array<i64: 1, 4, 8, 8>}, {transform_indices = @transform_7, window_bounds = array<i64: 1, 4, 8, 8>}]} {
    %c0 = arith.constant 0 : index
    %c0_0 = arith.constant 0 : index
    %c0_1 = arith.constant 0 : index
    %0 = vector.load %arg2[%c0, %c0_0, %c0_1] : memref<1x8x32xf32, #tpu.memory_space<vmem>>, vector<1x8x32xf32>
    %1 = vector.shape_cast %0 : vector<1x8x32xf32> to vector<8x32xf32>
    %c0_2 = arith.constant 0 : index
    %c0_3 = arith.constant 0 : index
    %2 = vector.load %arg3[%c0_2, %c0_3] : memref<1x32xf32, #tpu.memory_space<vmem>>, vector<1x32xf32>
    %c0_4 = arith.constant 0 : index
    %c0_5 = arith.constant 0 : index
    %3 = vector.load %arg4[%c0_4, %c0_5] : memref<1x32xf32, #tpu.memory_space<vmem>>, vector<1x32xf32>
    %cst = arith.constant dense<0.000000e+00> : vector<8xf32>
    %4 = vector.multi_reduction <add>, %1, %cst [1] : vector<8x32xf32> to vector<8xf32>
    %5 = vector.shape_cast %4 : vector<8xf32> to vector<8x1xf32>
    %cst_6 = arith.constant 3.200000e+01 : f32
    %6 = vector.broadcast %cst_6 : f32 to vector<8x1xf32>
    %7 = arith.divf %5, %6 : vector<8x1xf32>
    %8 = vector.broadcast %7 : vector<8x1xf32> to vector<8x32xf32>
    %9 = arith.subf %1, %8 : vector<8x32xf32>
    %10 = arith.mulf %9, %9 : vector<8x32xf32>
    %cst_7 = arith.constant dense<0.000000e+00> : vector<8xf32>
    %11 = vector.multi_reduction <add>, %10, %cst_7 [1] : vector<8x32xf32> to vector<8xf32>
    %12 = vector.shape_cast %11 : vector<8xf32> to vector<8x1xf32>
    %cst_8 = arith.constant 3.200000e+01 : f32
    %13 = vector.broadcast %cst_8 : f32 to vector<8x1xf32>
    %14 = arith.divf %12, %13 : vector<8x1xf32>
    %15 = vector.broadcast %7 : vector<8x1xf32> to vector<8x32xf32>
    %16 = arith.subf %1, %15 : vector<8x32xf32>
    %cst_9 = arith.constant 9.99999974E-6 : f32
    %17 = vector.broadcast %cst_9 : f32 to vector<8x1xf32>
    %18 = arith.addf %14, %17 : vector<8x1xf32>
    %19 = math.rsqrt %18 : vector<8x1xf32>
    %20 = vector.broadcast %19 : vector<8x1xf32> to vector<8x32xf32>
    %21 = arith.mulf %16, %20 : vector<8x32xf32>
    %22 = vector.broadcast %2 : vector<1x32xf32> to vector<8x32xf32>
    %23 = arith.mulf %21, %22 : vector<8x32xf32>
    %24 = vector.broadcast %3 : vector<1x32xf32> to vector<8x32xf32>
    %25 = arith.addf %23, %24 : vector<8x32xf32>
    %26 = arith.truncf %25 : vector<8x32xf32> to vector<8x32xbf16>
    %c0_10 = arith.constant 0 : index
    %c0_11 = arith.constant 0 : index
    %27 = vector.load %arg5[%c0_10, %c0_11] : memref<32x96xbf16, #tpu.memory_space<vmem>>, vector<32x96xbf16>
    %cst_12 = arith.constant dense<0.000000e+00> : vector<8x96xf32>
    %28 = tpu.matmul %26, %27, %cst_12 {dimension_numbers = #tpu.dot_dimension_numbers<[1], [0], [0], [1], [0, 0, 1, 1], [], []>} : vector<8x32xbf16>, vector<32x96xbf16>, vector<8x96xf32> -> vector<8x96xf32>
    %c0_13 = arith.constant 0 : index
    %c0_14 = arith.constant 0 : index
    %29 = vector.load %arg6[%c0_13, %c0_14] : memref<1x96xf32, #tpu.memory_space<vmem>>, vector<1x96xf32>
    %30 = vector.broadcast %29 : vector<1x96xf32> to vector<8x96xf32>
    %31 = arith.addf %28, %30 : vector<8x96xf32>
    %32 = vector.extract_strided_slice %31 {offsets = [0, 0], sizes = [8, 32], strides = [1, 1]} : vector<8x96xf32> to vector<8x32xf32>
    %cst_15 = arith.constant 0.353553385 : f32
    %33 = vector.broadcast %cst_15 : f32 to vector<8x32xf32>
    %34 = arith.mulf %32, %33 : vector<8x32xf32>
    %35 = arith.truncf %34 : vector<8x32xf32> to vector<8x32xbf16>
    %36 = vector.extract_strided_slice %31 {offsets = [0, 32], sizes = [8, 32], strides = [1, 1]} : vector<8x96xf32> to vector<8x32xf32>
    %37 = arith.truncf %36 : vector<8x32xf32> to vector<8x32xbf16>
    %38 = vector.extract_strided_slice %31 {offsets = [0, 64], sizes = [8, 32], strides = [1, 1]} : vector<8x96xf32> to vector<8x32xf32>
    %39 = arith.truncf %38 : vector<8x32xf32> to vector<8x32xbf16>
    %40 = vector.shape_cast %35 : vector<8x32xbf16> to vector<8x4x8xbf16>
    %41 = tpu.transpose %40, [1, 0, 2] : vector<8x4x8xbf16> -> vector<4x8x8xbf16>
    %c0_16 = arith.constant 0 : index
    %c0_17 = arith.constant 0 : index
    %c0_18 = arith.constant 0 : index
    %c0_19 = arith.constant 0 : index
    %42 = vector.load %arg7[%c0_16, %c0_17, %c0_18, %c0_19] : memref<1x4x8x8xbf16, #tpu.memory_space<vmem>>, vector<1x4x8x8xbf16>
    %43 = vector.shape_cast %42 : vector<1x4x8x8xbf16> to vector<4x8x8xbf16>
    %44 = vector.shape_cast %41 : vector<4x8x8xbf16> to vector<1x4x8x8xbf16>
    tpu.vector_store %arg7[%c0_16, %c0_17, %c0_18, %c0_19], %44 {strides = array<i32>} : memref<1x4x8x8xbf16, #tpu.memory_space<vmem>>, vector<1x4x8x8xbf16>,
    %45 = vector.shape_cast %37 : vector<8x32xbf16> to vector<8x4x8xbf16>
    %46 = tpu.transpose %45, [1, 0, 2] : vector<8x4x8xbf16> -> vector<4x8x8xbf16>
    %c0_20 = arith.constant 0 : index
    %c0_21 = arith.constant 0 : index
    %c0_22 = arith.constant 0 : index
    %c0_23 = arith.constant 0 : index
    %47 = vector.load %arg8[%c0_20, %c0_21, %c0_22, %c0_23] : memref<1x4x8x8xbf16, #tpu.memory_space<vmem>>, vector<1x4x8x8xbf16>
    %48 = vector.shape_cast %47 : vector<1x4x8x8xbf16> to vector<4x8x8xbf16>
    %49 = vector.shape_cast %46 : vector<4x8x8xbf16> to vector<1x4x8x8xbf16>
    tpu.vector_store %arg8[%c0_20, %c0_21, %c0_22, %c0_23], %49 {strides = array<i32>} : memref<1x4x8x8xbf16, #tpu.memory_space<vmem>>, vector<1x4x8x8xbf16>,
    %50 = vector.shape_cast %39 : vector<8x32xbf16> to vector<8x4x8xbf16>
    %51 = tpu.transpose %50, [1, 0, 2] : vector<8x4x8xbf16> -> vector<4x8x8xbf16>
    %c0_24 = arith.constant 0 : index
    %c0_25 = arith.constant 0 : index
    %c0_26 = arith.constant 0 : index
    %c0_27 = arith.constant 0 : index
    %52 = vector.load %arg9[%c0_24, %c0_25, %c0_26, %c0_27] : memref<1x4x8x8xbf16, #tpu.memory_space<vmem>>, vector<1x4x8x8xbf16>
    %53 = vector.shape_cast %52 : vector<1x4x8x8xbf16> to vector<4x8x8xbf16>
    %54 = vector.shape_cast %51 : vector<4x8x8xbf16> to vector<1x4x8x8xbf16>
    tpu.vector_store %arg9[%c0_24, %c0_25, %c0_26, %c0_27], %54 {strides = array<i32>} : memref<1x4x8x8xbf16, #tpu.memory_space<vmem>>, vector<1x4x8x8xbf16>,
    return
  }
  func.func @transform_0(%arg0: i32, %arg1: i32) -> (i32, i32, i32) {
    %c0_i32 = arith.constant 0 : i32
    %c0_i32_0 = arith.constant 0 : i32
    return %arg0, %arg1, %c0_i32 : i32, i32, i32
  }
  func.func @transform_1(%arg0: i32, %arg1: i32) -> (i32, i32) {
    %c0_i32 = arith.constant 0 : i32
    %c0_i32_0 = arith.constant 0 : i32
    %c0_i32_1 = arith.constant 0 : i32
    return %c0_i32, %c0_i32_0 : i32, i32
  }
  func.func @transform_2(%arg0: i32, %arg1: i32) -> (i32, i32) {
    %c0_i32 = arith.constant 0 : i32
    %c0_i32_0 = arith.constant 0 : i32
    %c0_i32_1 = arith.constant 0 : i32
    return %c0_i32, %c0_i32_0 : i32, i32
  }
  func.func @transform_3(%arg0: i32, %arg1: i32) -> (i32, i32) {
    %c0_i32 = arith.constant 0 : i32
    %c0_i32_0 = arith.constant 0 : i32
    %c0_i32_1 = arith.constant 0 : i32
    return %c0_i32, %c0_i32_0 : i32, i32
  }
  func.func @transform_4(%arg0: i32, %arg1: i32) -> (i32, i32) {
    %c0_i32 = arith.constant 0 : i32
    %c0_i32_0 = arith.constant 0 : i32
    %c0_i32_1 = arith.constant 0 : i32
    return %c0_i32, %c0_i32_0 : i32, i32
  }
  func.func @transform_5(%arg0: i32, %arg1: i32) -> (i32, i32, i32, i32) {
    %c0_i32 = arith.constant 0 : i32
    %c0_i32_0 = arith.constant 0 : i32
    %c0_i32_1 = arith.constant 0 : i32
    return %arg0, %c0_i32, %arg1, %c0_i32_0 : i32, i32, i32, i32
  }
  func.func @transform_6(%arg0: i32, %arg1: i32) -> (i32, i32, i32, i32) {
    %c0_i32 = arith.constant 0 : i32
    %c0_i32_0 = arith.constant 0 : i32
    %c0_i32_1 = arith.constant 0 : i32
    return %arg0, %c0_i32, %arg1, %c0_i32_0 : i32, i32, i32, i32
  }
  func.func @transform_7(%arg0: i32, %arg1: i32) -> (i32, i32, i32, i32) {
    %c0_i32 = arith.constant 0 : i32
    %c0_i32_0 = arith.constant 0 : i32
    %c0_i32_1 = arith.constant 0 : i32
    return %arg0, %c0_i32, %arg1, %c0_i32_0 : i32, i32, i32, i32
  }
}

module attributes {stable_mosaic.version = 11 : i64} {
  func.func @attn_mlp_kernel(%arg0: i32, %arg1: i32, %arg2: memref<1x8x32xf32, #tpu.memory_space<vmem>>, %arg3: memref<1x4x8x8xbf16, #tpu.memory_space<vmem>>, %arg4: memref<1x4x8x8xbf16, #tpu.memory_space<vmem>>, %arg5: memref<1x4x8x8xbf16, #tpu.memory_space<vmem>>, %arg6: memref<8x8xf32, #tpu.memory_space<vmem>>, %arg7: memref<32x32xbf16, #tpu.memory_space<vmem>>, %arg8: memref<1x32xf32, #tpu.memory_space<vmem>>, %arg9: memref<1x32xf32, #tpu.memory_space<vmem>>, %arg10: memref<1x32xf32, #tpu.memory_space<vmem>>, %arg11: memref<32x128xbf16, #tpu.memory_space<vmem>>, %arg12: memref<1x128xf32, #tpu.memory_space<vmem>>, %arg13: memref<128x32xbf16, #tpu.memory_space<vmem>>, %arg14: memref<1x32xf32, #tpu.memory_space<vmem>>, %arg15: memref<1x8x32xf32, #tpu.memory_space<vmem>>) attributes {dimension_semantics = [#tpu.dimension_semantics<parallel>, #tpu.dimension_semantics<parallel>], iteration_bounds = array<i64: 2, 1>, scalar_prefetch = 0 : i64, scratch_operands = 0 : i64, tpu.core_type = #tpu.core_type<tc>, window_params = [{transform_indices = @transform_0, window_bounds = array<i64: 1, 8, 32>}, {transform_indices = @transform_1, window_bounds = array<i64: 1, 4, 8, 8>}, {transform_indices = @transform_2, window_bounds = array<i64: 1, 4, 8, 8>}, {transform_indices = @transform_3, window_bounds = array<i64: 1, 4, 8, 8>}, {transform_indices = @transform_4, window_bounds = array<i64: 8, 8>}, {pipeline_mode = #tpu.pipeline_mode<synchronous>, transform_indices = @transform_5, window_bounds = array<i64: 32, 32>}, {pipeline_mode = #tpu.pipeline_mode<synchronous>, transform_indices = @transform_6, window_bounds = array<i64: 1, 32>}, {pipeline_mode = #tpu.pipeline_mode<synchronous>, transform_indices = @transform_7, window_bounds = array<i64: 1, 32>}, {pipeline_mode = #tpu.pipeline_mode<synchronous>, transform_indices = @transform_8, window_bounds = array<i64: 1, 32>}, {pipeline_mode = #tpu.pipeline_mode<synchronous>, transform_indices = @transform_9, window_bounds = array<i64: 32, 128>}, {pipeline_mode = #tpu.pipeline_mode<synchronous>, transform_indices = @transform_10, window_bounds = array<i64: 1, 128>}, {pipeline_mode = #tpu.pipeline_mode<synchronous>, transform_indices = @transform_11, window_bounds = array<i64: 128, 32>}, {pipeline_mode = #tpu.pipeline_mode<synchronous>, transform_indices = @transform_12, window_bounds = array<i64: 1, 32>}, {transform_indices = @transform_13, window_bounds = array<i64: 1, 8, 32>}]} {
    %c0 = arith.constant 0 : index
    %c0_0 = arith.constant 0 : index
    %c0_1 = arith.constant 0 : index
    %0 = vector.load %arg2[%c0, %c0_0, %c0_1] : memref<1x8x32xf32, #tpu.memory_space<vmem>>, vector<1x8x32xf32>
    %1 = vector.shape_cast %0 : vector<1x8x32xf32> to vector<8x32xf32>
    %c0_2 = arith.constant 0 : index
    %c0_3 = arith.constant 0 : index
    %c0_4 = arith.constant 0 : index
    %c0_5 = arith.constant 0 : index
    %2 = vector.load %arg3[%c0_2, %c0_3, %c0_4, %c0_5] : memref<1x4x8x8xbf16, #tpu.memory_space<vmem>>, vector<1x4x8x8xbf16>
    %3 = vector.shape_cast %2 : vector<1x4x8x8xbf16> to vector<4x8x8xbf16>
    %c0_6 = arith.constant 0 : index
    %c0_7 = arith.constant 0 : index
    %c0_8 = arith.constant 0 : index
    %c0_9 = arith.constant 0 : index
    %4 = vector.load %arg4[%c0_6, %c0_7, %c0_8, %c0_9] : memref<1x4x8x8xbf16, #tpu.memory_space<vmem>>, vector<1x4x8x8xbf16>
    %5 = vector.shape_cast %4 : vector<1x4x8x8xbf16> to vector<4x8x8xbf16>
    %c0_10 = arith.constant 0 : index
    %c0_11 = arith.constant 0 : index
    %c0_12 = arith.constant 0 : index
    %c0_13 = arith.constant 0 : index
    %6 = vector.load %arg5[%c0_10, %c0_11, %c0_12, %c0_13] : memref<1x4x8x8xbf16, #tpu.memory_space<vmem>>, vector<1x4x8x8xbf16>
    %7 = vector.shape_cast %6 : vector<1x4x8x8xbf16> to vector<4x8x8xbf16>
    "tpu.trace_start"() <{level = 10 : i32, message = "hqd,hkd->hqk"}> : () -> ()
    %cst = arith.constant dense<0.000000e+00> : vector<4x8x8xf32>
    %8 = tpu.matmul %3, %5, %cst {dimension_numbers = #tpu.dot_dimension_numbers<[2], [2], [1], [1], [0, 0, 0, 1, 1, 1], [0], [0]>} : vector<4x8x8xbf16>, vector<4x8x8xbf16>, vector<4x8x8xf32> -> vector<4x8x8xf32>
    "tpu.trace_stop"() : () -> ()
    %c0_14 = arith.constant 0 : index
    %c0_15 = arith.constant 0 : index
    %9 = vector.load %arg6[%c0_14, %c0_15] : memref<8x8xf32, #tpu.memory_space<vmem>>, vector<8x8xf32>
    %10 = vector.shape_cast %9 : vector<8x8xf32> to vector<1x8x8xf32>
    %11 = vector.broadcast %10 : vector<1x8x8xf32> to vector<4x8x8xf32>
    %12 = arith.addf %8, %11 : vector<4x8x8xf32>
    %cst_16 = arith.constant dense<0xFF800000> : vector<4x8xf32>
    %13 = vector.multi_reduction <maximumf>, %12, %cst_16 [2] : vector<4x8x8xf32> to vector<4x8xf32>
    %14 = vector.shape_cast %13 : vector<4x8xf32> to vector<4x8x1xf32>
    %15 = vector.broadcast %14 : vector<4x8x1xf32> to vector<4x8x8xf32>
    %16 = arith.subf %12, %15 : vector<4x8x8xf32>
    %17 = math.exp %16 : vector<4x8x8xf32>
    %cst_17 = arith.constant dense<0.000000e+00> : vector<4x8xf32>
    %18 = vector.multi_reduction <add>, %17, %cst_17 [2] : vector<4x8x8xf32> to vector<4x8xf32>
    %19 = vector.shape_cast %18 : vector<4x8xf32> to vector<4x8x1xf32>
    %20 = tpu.reciprocal %19 {approx = true} : vector<4x8x1xf32> -> vector<4x8x1xf32>
    %21 = vector.broadcast %20 : vector<4x8x1xf32> to vector<4x8x8xf32>
    %22 = arith.mulf %17, %21 : vector<4x8x8xf32>
    %23 = arith.truncf %22 : vector<4x8x8xf32> to vector<4x8x8xbf16>
    "tpu.trace_start"() <{level = 10 : i32, message = "hqk,hkd->hqd"}> : () -> ()
    %cst_18 = arith.constant dense<0.000000e+00> : vector<4x8x8xf32>
    %24 = tpu.matmul %23, %7, %cst_18 {dimension_numbers = #tpu.dot_dimension_numbers<[2], [1], [1], [2], [0, 0, 0, 1, 1, 2], [0], [0]>} : vector<4x8x8xbf16>, vector<4x8x8xbf16>, vector<4x8x8xf32> -> vector<4x8x8xf32>
    "tpu.trace_stop"() : () -> ()
    %25 = arith.truncf %24 : vector<4x8x8xf32> to vector<4x8x8xbf16>
    %26 = tpu.transpose %25, [1, 0, 2] : vector<4x8x8xbf16> -> vector<8x4x8xbf16>
    %27 = vector.shape_cast %26 : vector<8x4x8xbf16> to vector<8x32xbf16>
    %c0_19 = arith.constant 0 : index
    %c0_20 = arith.constant 0 : index
    %28 = vector.load %arg7[%c0_19, %c0_20] : memref<32x32xbf16, #tpu.memory_space<vmem>>, vector<32x32xbf16>
    %cst_21 = arith.constant dense<0.000000e+00> : vector<8x32xf32>
    %29 = tpu.matmul %27, %28, %cst_21 {dimension_numbers = #tpu.dot_dimension_numbers<[1], [0], [0], [1], [0, 0, 1, 1], [], []>} : vector<8x32xbf16>, vector<32x32xbf16>, vector<8x32xf32> -> vector<8x32xf32>
    %c0_22 = arith.constant 0 : index
    %c0_23 = arith.constant 0 : index
    %30 = vector.load %arg8[%c0_22, %c0_23] : memref<1x32xf32, #tpu.memory_space<vmem>>, vector<1x32xf32>
    %31 = vector.broadcast %30 : vector<1x32xf32> to vector<8x32xf32>
    %32 = arith.addf %29, %31 : vector<8x32xf32>
    %33 = arith.addf %1, %32 : vector<8x32xf32>
    %c0_24 = arith.constant 0 : index
    %c0_25 = arith.constant 0 : index
    %34 = vector.load %arg9[%c0_24, %c0_25] : memref<1x32xf32, #tpu.memory_space<vmem>>, vector<1x32xf32>
    %c0_26 = arith.constant 0 : index
    %c0_27 = arith.constant 0 : index
    %35 = vector.load %arg10[%c0_26, %c0_27] : memref<1x32xf32, #tpu.memory_space<vmem>>, vector<1x32xf32>
    %cst_28 = arith.constant dense<0.000000e+00> : vector<8xf32>
    %36 = vector.multi_reduction <add>, %33, %cst_28 [1] : vector<8x32xf32> to vector<8xf32>
    %37 = vector.shape_cast %36 : vector<8xf32> to vector<8x1xf32>
    %cst_29 = arith.constant 3.200000e+01 : f32
    %38 = vector.broadcast %cst_29 : f32 to vector<8x1xf32>
    %39 = arith.divf %37, %38 : vector<8x1xf32>
    %40 = vector.broadcast %39 : vector<8x1xf32> to vector<8x32xf32>
    %41 = arith.subf %33, %40 : vector<8x32xf32>
    %42 = arith.mulf %41, %41 : vector<8x32xf32>
    %cst_30 = arith.constant dense<0.000000e+00> : vector<8xf32>
    %43 = vector.multi_reduction <add>, %42, %cst_30 [1] : vector<8x32xf32> to vector<8xf32>
    %44 = vector.shape_cast %43 : vector<8xf32> to vector<8x1xf32>
    %cst_31 = arith.constant 3.200000e+01 : f32
    %45 = vector.broadcast %cst_31 : f32 to vector<8x1xf32>
    %46 = arith.divf %44, %45 : vector<8x1xf32>
    %47 = vector.broadcast %39 : vector<8x1xf32> to vector<8x32xf32>
    %48 = arith.subf %33, %47 : vector<8x32xf32>
    %cst_32 = arith.constant 9.99999974E-6 : f32
    %49 = vector.broadcast %cst_32 : f32 to vector<8x1xf32>
    %50 = arith.addf %46, %49 : vector<8x1xf32>
    %51 = math.rsqrt %50 : vector<8x1xf32>
    %52 = vector.broadcast %51 : vector<8x1xf32> to vector<8x32xf32>
    %53 = arith.mulf %48, %52 : vector<8x32xf32>
    %54 = vector.broadcast %34 : vector<1x32xf32> to vector<8x32xf32>
    %55 = arith.mulf %53, %54 : vector<8x32xf32>
    %56 = vector.broadcast %35 : vector<1x32xf32> to vector<8x32xf32>
    %57 = arith.addf %55, %56 : vector<8x32xf32>
    %58 = arith.truncf %57 : vector<8x32xf32> to vector<8x32xbf16>
    %c0_33 = arith.constant 0 : index
    %c0_34 = arith.constant 0 : index
    %59 = vector.load %arg11[%c0_33, %c0_34] : memref<32x128xbf16, #tpu.memory_space<vmem>>, vector<32x128xbf16>
    %cst_35 = arith.constant dense<0.000000e+00> : vector<8x128xf32>
    %60 = tpu.matmul %58, %59, %cst_35 {dimension_numbers = #tpu.dot_dimension_numbers<[1], [0], [0], [1], [0, 0, 1, 1], [], []>} : vector<8x32xbf16>, vector<32x128xbf16>, vector<8x128xf32> -> vector<8x128xf32>
    %c0_36 = arith.constant 0 : index
    %c0_37 = arith.constant 0 : index
    %61 = vector.load %arg12[%c0_36, %c0_37] : memref<1x128xf32, #tpu.memory_space<vmem>>, vector<1x128xf32>
    %62 = vector.broadcast %61 : vector<1x128xf32> to vector<8x128xf32>
    %63 = arith.addf %60, %62 : vector<8x128xf32>
    %64 = arith.mulf %63, %63 : vector<8x128xf32>
    %cst_38 = arith.constant 5.000000e-01 : f32
    %65 = vector.broadcast %cst_38 : f32 to vector<8x128xf32>
    %66 = arith.mulf %65, %63 : vector<8x128xf32>
    %cst_39 = arith.constant 0.0356774069 : f32
    %67 = vector.broadcast %cst_39 : f32 to vector<8x128xf32>
    %68 = arith.mulf %67, %64 : vector<8x128xf32>
    %cst_40 = arith.constant 0.797884583 : f32
    %69 = vector.broadcast %cst_40 : f32 to vector<8x128xf32>
    %70 = arith.addf %69, %68 : vector<8x128xf32>
    %71 = arith.mulf %63, %70 : vector<8x128xf32>
    %72 = math.tanh %71 : vector<8x128xf32>
    %cst_41 = arith.constant 1.000000e+00 : f32
    %73 = vector.broadcast %cst_41 : f32 to vector<8x128xf32>
    %74 = arith.addf %73, %72 : vector<8x128xf32>
    %75 = arith.mulf %66, %74 : vector<8x128xf32>
    %76 = arith.truncf %75 : vector<8x128xf32> to vector<8x128xbf16>
    %c0_42 = arith.constant 0 : index
    %c0_43 = arith.constant 0 : index
    %77 = vector.load %arg13[%c0_42, %c0_43] : memref<128x32xbf16, #tpu.memory_space<vmem>>, vector<128x32xbf16>
    %cst_44 = arith.constant dense<0.000000e+00> : vector<8x32xf32>
    %78 = tpu.matmul %76, %77, %cst_44 {dimension_numbers = #tpu.dot_dimension_numbers<[1], [0], [0], [1], [0, 0, 1, 1], [], []>} : vector<8x128xbf16>, vector<128x32xbf16>, vector<8x32xf32> -> vector<8x32xf32>
    %c0_45 = arith.constant 0 : index
    %c0_46 = arith.constant 0 : index
    %79 = vector.load %arg14[%c0_45, %c0_46] : memref<1x32xf32, #tpu.memory_space<vmem>>, vector<1x32xf32>
    %80 = vector.broadcast %79 : vector<1x32xf32> to vector<8x32xf32>
    %81 = arith.addf %78, %80 : vector<8x32xf32>
    %82 = arith.addf %33, %81 : vector<8x32xf32>
    %c0_47 = arith.constant 0 : index
    %c0_48 = arith.constant 0 : index
    %c0_49 = arith.constant 0 : index
    %83 = vector.load %arg15[%c0_47, %c0_48, %c0_49] : memref<1x8x32xf32, #tpu.memory_space<vmem>>, vector<1x8x32xf32>
    %84 = vector.shape_cast %83 : vector<1x8x32xf32> to vector<8x32xf32>
    %85 = vector.shape_cast %82 : vector<8x32xf32> to vector<1x8x32xf32>
    tpu.vector_store %arg15[%c0_47, %c0_48, %c0_49], %85 {strides = array<i32>} : memref<1x8x32xf32, #tpu.memory_space<vmem>>, vector<1x8x32xf32>,
    return
  }
  func.func @transform_0(%arg0: i32, %arg1: i32) -> (i32, i32, i32) {
    %c0_i32 = arith.constant 0 : i32
    %c0_i32_0 = arith.constant 0 : i32
    return %arg0, %arg1, %c0_i32 : i32, i32, i32
  }
  func.func @transform_1(%arg0: i32, %arg1: i32) -> (i32, i32, i32, i32) {
    %c0_i32 = arith.constant 0 : i32
    %c0_i32_0 = arith.constant 0 : i32
    %c0_i32_1 = arith.constant 0 : i32
    return %arg0, %c0_i32, %arg1, %c0_i32_0 : i32, i32, i32, i32
  }
  func.func @transform_2(%arg0: i32, %arg1: i32) -> (i32, i32, i32, i32) {
    %c0_i32 = arith.constant 0 : i32
    %c0_i32_0 = arith.constant 0 : i32
    %c0_i32_1 = arith.constant 0 : i32
    %c0_i32_2 = arith.constant 0 : i32
    return %arg0, %c0_i32, %c0_i32_0, %c0_i32_1 : i32, i32, i32, i32
  }
  func.func @transform_3(%arg0: i32, %arg1: i32) -> (i32, i32, i32, i32) {
    %c0_i32 = arith.constant 0 : i32
    %c0_i32_0 = arith.constant 0 : i32
    %c0_i32_1 = arith.constant 0 : i32
    %c0_i32_2 = arith.constant 0 : i32
    return %arg0, %c0_i32, %c0_i32_0, %c0_i32_1 : i32, i32, i32, i32
  }
  func.func @transform_4(%arg0: i32, %arg1: i32) -> (i32, i32) {
    %c0_i32 = arith.constant 0 : i32
    %c0_i32_0 = arith.constant 0 : i32
    return %arg1, %c0_i32 : i32, i32
  }
  func.func @transform_5(%arg0: i32, %arg1: i32) -> (i32, i32) {
    %c0_i32 = arith.constant 0 : i32
    %c0_i32_0 = arith.constant 0 : i32
    %c0_i32_1 = arith.constant 0 : i32
    return %c0_i32, %c0_i32_0 : i32, i32
  }
  func.func @transform_6(%arg0: i32, %arg1: i32) -> (i32, i32) {
    %c0_i32 = arith.constant 0 : i32
    %c0_i32_0 = arith.constant 0 : i32
    %c0_i32_1 = arith.constant 0 : i32
    return %c0_i32, %c0_i32_0 : i32, i32
  }
  func.func @transform_7(%arg0: i32, %arg1: i32) -> (i32, i32) {
    %c0_i32 = arith.constant 0 : i32
    %c0_i32_0 = arith.constant 0 : i32
    %c0_i32_1 = arith.constant 0 : i32
    return %c0_i32, %c0_i32_0 : i32, i32
  }
  func.func @transform_8(%arg0: i32, %arg1: i32) -> (i32, i32) {
    %c0_i32 = arith.constant 0 : i32
    %c0_i32_0 = arith.constant 0 : i32
    %c0_i32_1 = arith.constant 0 : i32
    return %c0_i32, %c0_i32_0 : i32, i32
  }
  func.func @transform_9(%arg0: i32, %arg1: i32) -> (i32, i32) {
    %c0_i32 = arith.constant 0 : i32
    %c0_i32_0 = arith.constant 0 : i32
    %c0_i32_1 = arith.constant 0 : i32
    return %c0_i32, %c0_i32_0 : i32, i32
  }
  func.func @transform_10(%arg0: i32, %arg1: i32) -> (i32, i32) {
    %c0_i32 = arith.constant 0 : i32
    %c0_i32_0 = arith.constant 0 : i32
    %c0_i32_1 = arith.constant 0 : i32
    return %c0_i32, %c0_i32_0 : i32, i32
  }
  func.func @transform_11(%arg0: i32, %arg1: i32) -> (i32, i32) {
    %c0_i32 = arith.constant 0 : i32
    %c0_i32_0 = arith.constant 0 : i32
    %c0_i32_1 = arith.constant 0 : i32
    return %c0_i32, %c0_i32_0 : i32, i32
  }
  func.func @transform_12(%arg0: i32, %arg1: i32) -> (i32, i32) {
    %c0_i32 = arith.constant 0 : i32
    %c0_i32_0 = arith.constant 0 : i32
    %c0_i32_1 = arith.constant 0 : i32
    return %c0_i32, %c0_i32_0 : i32, i32
  }
  func.func @transform_13(%arg0: i32, %arg1: i32) -> (i32, i32, i32) {
    %c0_i32 = arith.constant 0 : i32
    %c0_i32_0 = arith.constant 0 : i32
    return %arg0, %arg1, %c0_i32 : i32, i32, i32
  }
}

module attributes {stable_mosaic.version = 11 : i64} {
  func.func @attn_mlp_kernel(%arg0: i32, %arg1: i32, %arg2: memref<1x8x32xf32, #tpu.memory_space<vmem>>, %arg3: memref<1x4x8x8xbf16, #tpu.memory_space<vmem>>, %arg4: memref<1x4x8x8xbf16, #tpu.memory_space<vmem>>, %arg5: memref<1x4x8x8xbf16, #tpu.memory_space<vmem>>, %arg6: memref<8x8xf32, #tpu.memory_space<vmem>>, %arg7: memref<32x32xbf16, #tpu.memory_space<vmem>>, %arg8: memref<1x32xf32, #tpu.memory_space<vmem>>, %arg9: memref<1x32xf32, #tpu.memory_space<vmem>>, %arg10: memref<1x32xf32, #tpu.memory_space<vmem>>, %arg11: memref<32x128xbf16, #tpu.memory_space<vmem>>, %arg12: memref<1x128xf32, #tpu.memory_space<vmem>>, %arg13: memref<128x32xbf16, #tpu.memory_space<vmem>>, %arg14: memref<1x32xf32, #tpu.memory_space<vmem>>, %arg15: memref<1x32xf32, #tpu.memory_space<vmem>>, %arg16: memref<1x32xf32, #tpu.memory_space<vmem>>, %arg17: memref<1x8x32xf32, #tpu.memory_space<vmem>>) attributes {dimension_semantics = [#tpu.dimension_semantics<parallel>, #tpu.dimension_semantics<parallel>], iteration_bounds = array<i64: 2, 1>, scalar_prefetch = 0 : i64, scratch_operands = 0 : i64, tpu.core_type = #tpu.core_type<tc>, window_params = [{transform_indices = @transform_0, window_bounds = array<i64: 1, 8, 32>}, {transform_indices = @transform_1, window_bounds = array<i64: 1, 4, 8, 8>}, {transform_indices = @transform_2, window_bounds = array<i64: 1, 4, 8, 8>}, {transform_indices = @transform_3, window_bounds = array<i64: 1, 4, 8, 8>}, {transform_indices = @transform_4, window_bounds = array<i64: 8, 8>}, {pipeline_mode = #tpu.pipeline_mode<synchronous>, transform_indices = @transform_5, window_bounds = array<i64: 32, 32>}, {pipeline_mode = #tpu.pipeline_mode<synchronous>, transform_indices = @transform_6, window_bounds = array<i64: 1, 32>}, {pipeline_mode = #tpu.pipeline_mode<synchronous>, transform_indices = @transform_7, window_bounds = array<i64: 1, 32>}, {pipeline_mode = #tpu.pipeline_mode<synchronous>, transform_indices = @transform_8, window_bounds = array<i64: 1, 32>}, {pipeline_mode = #tpu.pipeline_mode<synchronous>, transform_indices = @transform_9, window_bounds = array<i64: 32, 128>}, {pipeline_mode = #tpu.pipeline_mode<synchronous>, transform_indices = @transform_10, window_bounds = array<i64: 1, 128>}, {pipeline_mode = #tpu.pipeline_mode<synchronous>, transform_indices = @transform_11, window_bounds = array<i64: 128, 32>}, {pipeline_mode = #tpu.pipeline_mode<synchronous>, transform_indices = @transform_12, window_bounds = array<i64: 1, 32>}, {pipeline_mode = #tpu.pipeline_mode<synchronous>, transform_indices = @transform_13, window_bounds = array<i64: 1, 32>}, {pipeline_mode = #tpu.pipeline_mode<synchronous>, transform_indices = @transform_14, window_bounds = array<i64: 1, 32>}, {transform_indices = @transform_15, window_bounds = array<i64: 1, 8, 32>}]} {
    %c0 = arith.constant 0 : index
    %c0_0 = arith.constant 0 : index
    %c0_1 = arith.constant 0 : index
    %0 = vector.load %arg2[%c0, %c0_0, %c0_1] : memref<1x8x32xf32, #tpu.memory_space<vmem>>, vector<1x8x32xf32>
    %1 = vector.shape_cast %0 : vector<1x8x32xf32> to vector<8x32xf32>
    %c0_2 = arith.constant 0 : index
    %c0_3 = arith.constant 0 : index
    %c0_4 = arith.constant 0 : index
    %c0_5 = arith.constant 0 : index
    %2 = vector.load %arg3[%c0_2, %c0_3, %c0_4, %c0_5] : memref<1x4x8x8xbf16, #tpu.memory_space<vmem>>, vector<1x4x8x8xbf16>
    %3 = vector.shape_cast %2 : vector<1x4x8x8xbf16> to vector<4x8x8xbf16>
    %c0_6 = arith.constant 0 : index
    %c0_7 = arith.constant 0 : index
    %c0_8 = arith.constant 0 : index
    %c0_9 = arith.constant 0 : index
    %4 = vector.load %arg4[%c0_6, %c0_7, %c0_8, %c0_9] : memref<1x4x8x8xbf16, #tpu.memory_space<vmem>>, vector<1x4x8x8xbf16>
    %5 = vector.shape_cast %4 : vector<1x4x8x8xbf16> to vector<4x8x8xbf16>
    %c0_10 = arith.constant 0 : index
    %c0_11 = arith.constant 0 : index
    %c0_12 = arith.constant 0 : index
    %c0_13 = arith.constant 0 : index
    %6 = vector.load %arg5[%c0_10, %c0_11, %c0_12, %c0_13] : memref<1x4x8x8xbf16, #tpu.memory_space<vmem>>, vector<1x4x8x8xbf16>
    %7 = vector.shape_cast %6 : vector<1x4x8x8xbf16> to vector<4x8x8xbf16>
    "tpu.trace_start"() <{level = 10 : i32, message = "hqd,hkd->hqk"}> : () -> ()
    %cst = arith.constant dense<0.000000e+00> : vector<4x8x8xf32>
    %8 = tpu.matmul %3, %5, %cst {dimension_numbers = #tpu.dot_dimension_numbers<[2], [2], [1], [1], [0, 0, 0, 1, 1, 1], [0], [0]>} : vector<4x8x8xbf16>, vector<4x8x8xbf16>, vector<4x8x8xf32> -> vector<4x8x8xf32>
    "tpu.trace_stop"() : () -> ()
    %c0_14 = arith.constant 0 : index
    %c0_15 = arith.constant 0 : index
    %9 = vector.load %arg6[%c0_14, %c0_15] : memref<8x8xf32, #tpu.memory_space<vmem>>, vector<8x8xf32>
    %10 = vector.shape_cast %9 : vector<8x8xf32> to vector<1x8x8xf32>
    %11 = vector.broadcast %10 : vector<1x8x8xf32> to vector<4x8x8xf32>
    %12 = arith.addf %8, %11 : vector<4x8x8xf32>
    %cst_16 = arith.constant dense<0xFF800000> : vector<4x8xf32>
    %13 = vector.multi_reduction <maximumf>, %12, %cst_16 [2] : vector<4x8x8xf32> to vector<4x8xf32>
    %14 = vector.shape_cast %13 : vector<4x8xf32> to vector<4x8x1xf32>
    %15 = vector.broadcast %14 : vector<4x8x1xf32> to vector<4x8x8xf32>
    %16 = arith.subf %12, %15 : vector<4x8x8xf32>
    %17 = math.exp %16 : vector<4x8x8xf32>
    %cst_17 = arith.constant dense<0.000000e+00> : vector<4x8xf32>
    %18 = vector.multi_reduction <add>, %17, %cst_17 [2] : vector<4x8x8xf32> to vector<4x8xf32>
    %19 = vector.shape_cast %18 : vector<4x8xf32> to vector<4x8x1xf32>
    %20 = tpu.reciprocal %19 {approx = true} : vector<4x8x1xf32> -> vector<4x8x1xf32>
    %21 = vector.broadcast %20 : vector<4x8x1xf32> to vector<4x8x8xf32>
    %22 = arith.mulf %17, %21 : vector<4x8x8xf32>
    %23 = arith.truncf %22 : vector<4x8x8xf32> to vector<4x8x8xbf16>
    "tpu.trace_start"() <{level = 10 : i32, message = "hqk,hkd->hqd"}> : () -> ()
    %cst_18 = arith.constant dense<0.000000e+00> : vector<4x8x8xf32>
    %24 = tpu.matmul %23, %7, %cst_18 {dimension_numbers = #tpu.dot_dimension_numbers<[2], [1], [1], [2], [0, 0, 0, 1, 1, 2], [0], [0]>} : vector<4x8x8xbf16>, vector<4x8x8xbf16>, vector<4x8x8xf32> -> vector<4x8x8xf32>
    "tpu.trace_stop"() : () -> ()
    %25 = arith.truncf %24 : vector<4x8x8xf32> to vector<4x8x8xbf16>
    %26 = tpu.transpose %25, [1, 0, 2] : vector<4x8x8xbf16> -> vector<8x4x8xbf16>
    %27 = vector.shape_cast %26 : vector<8x4x8xbf16> to vector<8x32xbf16>
    %c0_19 = arith.constant 0 : index
    %c0_20 = arith.constant 0 : index
    %28 = vector.load %arg7[%c0_19, %c0_20] : memref<32x32xbf16, #tpu.memory_space<vmem>>, vector<32x32xbf16>
    %cst_21 = arith.constant dense<0.000000e+00> : vector<8x32xf32>
    %29 = tpu.matmul %27, %28, %cst_21 {dimension_numbers = #tpu.dot_dimension_numbers<[1], [0], [0], [1], [0, 0, 1, 1], [], []>} : vector<8x32xbf16>, vector<32x32xbf16>, vector<8x32xf32> -> vector<8x32xf32>
    %c0_22 = arith.constant 0 : index
    %c0_23 = arith.constant 0 : index
    %30 = vector.load %arg8[%c0_22, %c0_23] : memref<1x32xf32, #tpu.memory_space<vmem>>, vector<1x32xf32>
    %31 = vector.broadcast %30 : vector<1x32xf32> to vector<8x32xf32>
    %32 = arith.addf %29, %31 : vector<8x32xf32>
    %33 = arith.addf %1, %32 : vector<8x32xf32>
    %c0_24 = arith.constant 0 : index
    %c0_25 = arith.constant 0 : index
    %34 = vector.load %arg9[%c0_24, %c0_25] : memref<1x32xf32, #tpu.memory_space<vmem>>, vector<1x32xf32>
    %c0_26 = arith.constant 0 : index
    %c0_27 = arith.constant 0 : index
    %35 = vector.load %arg10[%c0_26, %c0_27] : memref<1x32xf32, #tpu.memory_space<vmem>>, vector<1x32xf32>
    %cst_28 = arith.constant dense<0.000000e+00> : vector<8xf32>
    %36 = vector.multi_reduction <add>, %33, %cst_28 [1] : vector<8x32xf32> to vector<8xf32>
    %37 = vector.shape_cast %36 : vector<8xf32> to vector<8x1xf32>
    %cst_29 = arith.constant 3.200000e+01 : f32
    %38 = vector.broadcast %cst_29 : f32 to vector<8x1xf32>
    %39 = arith.divf %37, %38 : vector<8x1xf32>
    %40 = vector.broadcast %39 : vector<8x1xf32> to vector<8x32xf32>
    %41 = arith.subf %33, %40 : vector<8x32xf32>
    %42 = arith.mulf %41, %41 : vector<8x32xf32>
    %cst_30 = arith.constant dense<0.000000e+00> : vector<8xf32>
    %43 = vector.multi_reduction <add>, %42, %cst_30 [1] : vector<8x32xf32> to vector<8xf32>
    %44 = vector.shape_cast %43 : vector<8xf32> to vector<8x1xf32>
    %cst_31 = arith.constant 3.200000e+01 : f32
    %45 = vector.broadcast %cst_31 : f32 to vector<8x1xf32>
    %46 = arith.divf %44, %45 : vector<8x1xf32>
    %47 = vector.broadcast %39 : vector<8x1xf32> to vector<8x32xf32>
    %48 = arith.subf %33, %47 : vector<8x32xf32>
    %cst_32 = arith.constant 9.99999974E-6 : f32
    %49 = vector.broadcast %cst_32 : f32 to vector<8x1xf32>
    %50 = arith.addf %46, %49 : vector<8x1xf32>
    %51 = math.rsqrt %50 : vector<8x1xf32>
    %52 = vector.broadcast %51 : vector<8x1xf32> to vector<8x32xf32>
    %53 = arith.mulf %48, %52 : vector<8x32xf32>
    %54 = vector.broadcast %34 : vector<1x32xf32> to vector<8x32xf32>
    %55 = arith.mulf %53, %54 : vector<8x32xf32>
    %56 = vector.broadcast %35 : vector<1x32xf32> to vector<8x32xf32>
    %57 = arith.addf %55, %56 : vector<8x32xf32>
    %58 = arith.truncf %57 : vector<8x32xf32> to vector<8x32xbf16>
    %c0_33 = arith.constant 0 : index
    %c0_34 = arith.constant 0 : index
    %59 = vector.load %arg11[%c0_33, %c0_34] : memref<32x128xbf16, #tpu.memory_space<vmem>>, vector<32x128xbf16>
    %cst_35 = arith.constant dense<0.000000e+00> : vector<8x128xf32>
    %60 = tpu.matmul %58, %59, %cst_35 {dimension_numbers = #tpu.dot_dimension_numbers<[1], [0], [0], [1], [0, 0, 1, 1], [], []>} : vector<8x32xbf16>, vector<32x128xbf16>, vector<8x128xf32> -> vector<8x128xf32>
    %c0_36 = arith.constant 0 : index
    %c0_37 = arith.constant 0 : index
    %61 = vector.load %arg12[%c0_36, %c0_37] : memref<1x128xf32, #tpu.memory_space<vmem>>, vector<1x128xf32>
    %62 = vector.broadcast %61 : vector<1x128xf32> to vector<8x128xf32>
    %63 = arith.addf %60, %62 : vector<8x128xf32>
    %64 = arith.mulf %63, %63 : vector<8x128xf32>
    %cst_38 = arith.constant 5.000000e-01 : f32
    %65 = vector.broadcast %cst_38 : f32 to vector<8x128xf32>
    %66 = arith.mulf %65, %63 : vector<8x128xf32>
    %cst_39 = arith.constant 0.0356774069 : f32
    %67 = vector.broadcast %cst_39 : f32 to vector<8x128xf32>
    %68 = arith.mulf %67, %64 : vector<8x128xf32>
    %cst_40 = arith.constant 0.797884583 : f32
    %69 = vector.broadcast %cst_40 : f32 to vector<8x128xf32>
    %70 = arith.addf %69, %68 : vector<8x128xf32>
    %71 = arith.mulf %63, %70 : vector<8x128xf32>
    %72 = math.tanh %71 : vector<8x128xf32>
    %cst_41 = arith.constant 1.000000e+00 : f32
    %73 = vector.broadcast %cst_41 : f32 to vector<8x128xf32>
    %74 = arith.addf %73, %72 : vector<8x128xf32>
    %75 = arith.mulf %66, %74 : vector<8x128xf32>
    %76 = arith.truncf %75 : vector<8x128xf32> to vector<8x128xbf16>
    %c0_42 = arith.constant 0 : index
    %c0_43 = arith.constant 0 : index
    %77 = vector.load %arg13[%c0_42, %c0_43] : memref<128x32xbf16, #tpu.memory_space<vmem>>, vector<128x32xbf16>
    %cst_44 = arith.constant dense<0.000000e+00> : vector<8x32xf32>
    %78 = tpu.matmul %76, %77, %cst_44 {dimension_numbers = #tpu.dot_dimension_numbers<[1], [0], [0], [1], [0, 0, 1, 1], [], []>} : vector<8x128xbf16>, vector<128x32xbf16>, vector<8x32xf32> -> vector<8x32xf32>
    %c0_45 = arith.constant 0 : index
    %c0_46 = arith.constant 0 : index
    %79 = vector.load %arg14[%c0_45, %c0_46] : memref<1x32xf32, #tpu.memory_space<vmem>>, vector<1x32xf32>
    %80 = vector.broadcast %79 : vector<1x32xf32> to vector<8x32xf32>
    %81 = arith.addf %78, %80 : vector<8x32xf32>
    %82 = arith.addf %33, %81 : vector<8x32xf32>
    %c0_47 = arith.constant 0 : index
    %c0_48 = arith.constant 0 : index
    %83 = vector.load %arg15[%c0_47, %c0_48] : memref<1x32xf32, #tpu.memory_space<vmem>>, vector<1x32xf32>
    %c0_49 = arith.constant 0 : index
    %c0_50 = arith.constant 0 : index
    %84 = vector.load %arg16[%c0_49, %c0_50] : memref<1x32xf32, #tpu.memory_space<vmem>>, vector<1x32xf32>
    %cst_51 = arith.constant dense<0.000000e+00> : vector<8xf32>
    %85 = vector.multi_reduction <add>, %82, %cst_51 [1] : vector<8x32xf32> to vector<8xf32>
    %86 = vector.shape_cast %85 : vector<8xf32> to vector<8x1xf32>
    %cst_52 = arith.constant 3.200000e+01 : f32
    %87 = vector.broadcast %cst_52 : f32 to vector<8x1xf32>
    %88 = arith.divf %86, %87 : vector<8x1xf32>
    %89 = vector.broadcast %88 : vector<8x1xf32> to vector<8x32xf32>
    %90 = arith.subf %82, %89 : vector<8x32xf32>
    %91 = arith.mulf %90, %90 : vector<8x32xf32>
    %cst_53 = arith.constant dense<0.000000e+00> : vector<8xf32>
    %92 = vector.multi_reduction <add>, %91, %cst_53 [1] : vector<8x32xf32> to vector<8xf32>
    %93 = vector.shape_cast %92 : vector<8xf32> to vector<8x1xf32>
    %cst_54 = arith.constant 3.200000e+01 : f32
    %94 = vector.broadcast %cst_54 : f32 to vector<8x1xf32>
    %95 = arith.divf %93, %94 : vector<8x1xf32>
    %96 = vector.broadcast %88 : vector<8x1xf32> to vector<8x32xf32>
    %97 = arith.subf %82, %96 : vector<8x32xf32>
    %cst_55 = arith.constant 9.99999974E-6 : f32
    %98 = vector.broadcast %cst_55 : f32 to vector<8x1xf32>
    %99 = arith.addf %95, %98 : vector<8x1xf32>
    %100 = math.rsqrt %99 : vector<8x1xf32>
    %101 = vector.broadcast %100 : vector<8x1xf32> to vector<8x32xf32>
    %102 = arith.mulf %97, %101 : vector<8x32xf32>
    %103 = vector.broadcast %83 : vector<1x32xf32> to vector<8x32xf32>
    %104 = arith.mulf %102, %103 : vector<8x32xf32>
    %105 = vector.broadcast %84 : vector<1x32xf32> to vector<8x32xf32>
    %106 = arith.addf %104, %105 : vector<8x32xf32>
    %c0_56 = arith.constant 0 : index
    %c0_57 = arith.constant 0 : index
    %c0_58 = arith.constant 0 : index
    %107 = vector.load %arg17[%c0_56, %c0_57, %c0_58] : memref<1x8x32xf32, #tpu.memory_space<vmem>>, vector<1x8x32xf32>
    %108 = vector.shape_cast %107 : vector<1x8x32xf32> to vector<8x32xf32>
    %109 = vector.shape_cast %106 : vector<8x32xf32> to vector<1x8x32xf32>
    tpu.vector_store %arg17[%c0_56, %c0_57, %c0_58], %109 {strides = array<i32>} : memref<1x8x32xf32, #tpu.memory_space<vmem>>, vector<1x8x32xf32>,
    return
  }
  func.func @transform_0(%arg0: i32, %arg1: i32) -> (i32, i32, i32) {
    %c0_i32 = arith.constant 0 : i32
    %c0_i32_0 = arith.constant 0 : i32
    return %arg0, %arg1, %c0_i32 : i32, i32, i32
  }
  func.func @transform_1(%arg0: i32, %arg1: i32) -> (i32, i32, i32, i32) {
    %c0_i32 = arith.constant 0 : i32
    %c0_i32_0 = arith.constant 0 : i32
    %c0_i32_1 = arith.constant 0 : i32
    return %arg0, %c0_i32, %arg1, %c0_i32_0 : i32, i32, i32, i32
  }
  func.func @transform_2(%arg0: i32, %arg1: i32) -> (i32, i32, i32, i32) {
    %c0_i32 = arith.constant 0 : i32
    %c0_i32_0 = arith.constant 0 : i32
    %c0_i32_1 = arith.constant 0 : i32
    %c0_i32_2 = arith.constant 0 : i32
    return %arg0, %c0_i32, %c0_i32_0, %c0_i32_1 : i32, i32, i32, i32
  }
  func.func @transform_3(%arg0: i32, %arg1: i32) -> (i32, i32, i32, i32) {
    %c0_i32 = arith.constant 0 : i32
    %c0_i32_0 = arith.constant 0 : i32
    %c0_i32_1 = arith.constant 0 : i32
    %c0_i32_2 = arith.constant 0 : i32
    return %arg0, %c0_i32, %c0_i32_0, %c0_i32_1 : i32, i32, i32, i32
  }
  func.func @transform_4(%arg0: i32, %arg1: i32) -> (i32, i32) {
    %c0_i32 = arith.constant 0 : i32
    %c0_i32_0 = arith.constant 0 : i32
    return %arg1, %c0_i32 : i32, i32
  }
  func.func @transform_5(%arg0: i32, %arg1: i32) -> (i32, i32) {
    %c0_i32 = arith.constant 0 : i32
    %c0_i32_0 = arith.constant 0 : i32
    %c0_i32_1 = arith.constant 0 : i32
    return %c0_i32, %c0_i32_0 : i32, i32
  }
  func.func @transform_6(%arg0: i32, %arg1: i32) -> (i32, i32) {
    %c0_i32 = arith.constant 0 : i32
    %c0_i32_0 = arith.constant 0 : i32
    %c0_i32_1 = arith.constant 0 : i32
    return %c0_i32, %c0_i32_0 : i32, i32
  }
  func.func @transform_7(%arg0: i32, %arg1: i32) -> (i32, i32) {
    %c0_i32 = arith.constant 0 : i32
    %c0_i32_0 = arith.constant 0 : i32
    %c0_i32_1 = arith.constant 0 : i32
    return %c0_i32, %c0_i32_0 : i32, i32
  }
  func.func @transform_8(%arg0: i32, %arg1: i32) -> (i32, i32) {
    %c0_i32 = arith.constant 0 : i32
    %c0_i32_0 = arith.constant 0 : i32
    %c0_i32_1 = arith.constant 0 : i32
    return %c0_i32, %c0_i32_0 : i32, i32
  }
  func.func @transform_9(%arg0: i32, %arg1: i32) -> (i32, i32) {
    %c0_i32 = arith.constant 0 : i32
    %c0_i32_0 = arith.constant 0 : i32
    %c0_i32_1 = arith.constant 0 : i32
    return %c0_i32, %c0_i32_0 : i32, i32
  }
  func.func @transform_10(%arg0: i32, %arg1: i32) -> (i32, i32) {
    %c0_i32 = arith.constant 0 : i32
    %c0_i32_0 = arith.constant 0 : i32
    %c0_i32_1 = arith.constant 0 : i32
    return %c0_i32, %c0_i32_0 : i32, i32
  }
  func.func @transform_11(%arg0: i32, %arg1: i32) -> (i32, i32) {
    %c0_i32 = arith.constant 0 : i32
    %c0_i32_0 = arith.constant 0 : i32
    %c0_i32_1 = arith.constant 0 : i32
    return %c0_i32, %c0_i32_0 : i32, i32
  }
  func.func @transform_12(%arg0: i32, %arg1: i32) -> (i32, i32) {
    %c0_i32 = arith.constant 0 : i32
    %c0_i32_0 = arith.constant 0 : i32
    %c0_i32_1 = arith.constant 0 : i32
    return %c0_i32, %c0_i32_0 : i32, i32
  }
  func.func @transform_13(%arg0: i32, %arg1: i32) -> (i32, i32) {
    %c0_i32 = arith.constant 0 : i32
    %c0_i32_0 = arith.constant 0 : i32
    %c0_i32_1 = arith.constant 0 : i32
    return %c0_i32, %c0_i32_0 : i32, i32
  }
  func.func @transform_14(%arg0: i32, %arg1: i32) -> (i32, i32) {
    %c0_i32 = arith.constant 0 : i32
    %c0_i32_0 = arith.constant 0 : i32
    %c0_i32_1 = arith.constant 0 : i32
    return %c0_i32, %c0_i32_0 : i32, i32
  }
  func.func @transform_15(%arg0: i32, %arg1: i32) -> (i32, i32, i32) {
    %c0_i32 = arith.constant 0 : i32
    %c0_i32_0 = arith.constant 0 : i32
    return %arg0, %arg1, %c0_i32 : i32, i32, i32
  }
}

</mosaic_0001>

<bundles_post_ra>
// kernel: msk_forward.12
= control target key start
LH: loop header
LB: loop body
LE: loop exit
PB: predicated region body
PF: predicated region fallthrough
CT: control target
= control target key end

     0   :  { %s1311_s24 = smov 0   ;;  %s1313_s25 = smov 0   ;;  %s1459_s0 = inlined_call_operand.vmem [shape: f32[2,8,32], index: 0, kind: input, shape index: {}]   ;;  %s1460_s1 = inlined_call_operand.vmem [shape: f32[1,32], index: 1, kind: input, shape index: {}]   ;;  %s1461_s2 = inlined_call_operand.vmem [shape: f32[1,32], index: 2, kind: input, shape index: {}]   ;;  %s1462_s3 = inlined_call_operand.vmem [shape: bf16[32,96], index: 3, kind: input, shape index: {}]   ;;  %s1463_s4 = inlined_call_operand.vmem [shape: f32[1,96], index: 4, kind: input, shape index: {}]   ;;  %s1464_s5 = inlined_call_operand.vmem [shape: bf16[2,4,8,8], index: 5, kind: output, shape index: {0}]   ;;  %s1465_s6 = inlined_call_operand.vmem [shape: bf16[2,4,8,8], index: 6, kind: output, shape index: {1}]   ;;  %s1466_s7 = inlined_call_operand.vmem [shape: bf16[2,4,8,8], index: 7, kind: output, shape index: {2}]  }
   0x1   :  { %s1315_s26 = smov 0  }
   0x2 LB: > { %s30_s27 = sadd.s32 1, %s1255_s25  ;;  %p1169_p0 = scmp.ge.s32.totalorder %s1259_s26, 1  ;;  %s1259_s26 = sphi %s1315_s26, %s18_s26   ;;  %s1255_s25 = sphi %s1313_s25, %s1468_s25   ;;  %s1251_s24 = sphi %s1311_s24, %s1467_s24  }
   0x3   : > { %p32_p1 = scmp.ge.s32.totalorder %s30_s27, 2  ;;  %p264_p2 = scmp.lt.s32.totalorder %s1259_s26, 3 }
   0x5   : > { %s1470_s27 = smov (%p32_p1, %s30_s27), 0  ;;  %p265_p3 = pnand %p1169_p0, %p264_p2 }
   0x6   : > { %p317_p4 = scmp.lt.s32.totalorder (!%p265_p3), %s1251_s24, 1  ;;  %vm352_vm0 = vcmask (!%p265_p3), 261120   ;;  %v1233_v7 = vld [vmem:[%s1462_s3] sm:$0xff] (!%p265_p3)   ;;  %v1261_v8 = vmov (!%p265_p3), 0.0   ;;  %vm1262_vm1 = vmmov (!%p265_p3), 0   ;;  %v1234_v9 = vld [vmem:[%s1462_s3 + $0x8] sm:$0xff] (!%p265_p3)   ;;  %v461_v35 = vlaneseq (!%p265_p3) }
   0x7   : > { %268 = sbr.rel (%p265_p3) target bundleno = 821 (0x335), region = 40  ;;  %1191 = vmatprep.subr.bf16.mxu0 (!%p265_p3), %v1261_v8  ;;  %1195 = vmatprep.mubr.msk.bf16.mxu0 (!%p265_p3), %vm1262_vm1, %v1261_v8  ;;  %v1177_v14 = vld [vmem:[%s1460_s1] ss:$0 sm:$0xff] (!%p265_p3)  ;;  %s1263_s19 = smov (!%p265_p3), 104   ;;  %v1268_v33 = vmov (!%p265_p3), 1983009808  }
   0x8   : > { %1192 = vmatpush3.bf16.msra.mxu0 (!%p265_p3), %v1233_v7  ;;  %v1178_v16 = vld [vmem:[%s1461_s2] ss:$0 sm:$0xff] (!%p265_p3)  ;;  %s1264_s20 = smov (!%p265_p3), 120   ;;  %s1265_s21 = smov (!%p265_p3), 112   ;;  %v459_v34 = vunpack.c.l.s4 (!%p265_p3), %v1268_v33  ;;  %v462_v38 = vshrl.u32 (!%p265_p3), %v461_v35, 7  ;;  %v1270_v57 = vmov (!%p265_p3), 0  }
   0x9   : > { %1193 = vmatprep.subr.bf16.mxu0 (!%p265_p3), %v1261_v8  ;;  %v1179_v20 = vld [vmem:[%s1463_s4] ss:$0 sm:$0xff] (!%p265_p3)  ;;  %s1266_s22 = smov (!%p265_p3), 96   ;;  %s1267_s23 = smov (!%p265_p3), 64   ;;  %v1269_v39 = vmov (!%p265_p3), 1934713408  }
   0xa   : > { %v460_v37 = vunpack.c.0.s8 (!%p265_p3), %v459_v34  ;;  %v476_v40 = vunpack.c.l.s4 (!%p265_p3), %v1269_v39  ;;  %vm623_vm2 = vcmask (!%p265_p3), 60416  }
   0xc   : > { %1194 = vmatpush3.bf16.msra.mxu0 (!%p265_p3), %v1234_v9  ;;  %v1357_v42 = vsub.s32 (!%p265_p3), %v460_v37, %v462_v38  ;;  %v477_v43 = vunpack.c.0.s8 (!%p265_p3), %v476_v40 }
   0xe   : > { %s1472_s24 = smov (!%p317_p4, %s1251_s24), 1  ;;  %v1359_v45 = vsub.s32 %v477_v43, %v462_v38 }
   0xf   : > { %s1170_s28 = sshll.u32 %s1472_s24, 3 }
  0x10   : > { %s323_s8 = scalar_lea.vmem %s1459_s0, %s1170_s28  ;;  %s1379_s28 = sshll.u32 %s1472_s24, 4 }
  0x11   : > { %v349_v0 = vld [vmem:[%s323_s8] sm:$0xff]  ;;  %s331_s8 = scalar_lea.vmem %s1464_s5, %s1379_s28  ;;  %s339_s10 = scalar_lea.vmem %s1465_s6, %s1379_s28 }
  0x12   : > { %v353_v1 = vsel %vm352_vm0, %v349_v0, 0.0  ;;  %s347_s13 = scalar_lea.vmem %s1466_s7, %s1379_s28 }
  0x13   : > { %354 = vadd.xlane.f32.xlu0 %v353_v1 }
  0xa0   : > { %v355_v2 = vpop.xlane.xlu0 %354 }
  0xa1   : > { %v357_v3 = vmul.f32 0.03125, %v355_v2 }
  0xa3   : > { %v358_v4 = vsub.f32 %v349_v0, %v357_v3 }
  0xa5   : > { %v359_v5 = vmul.f32 %v358_v4, %v358_v4 }
  0xa7   : > { %v360_v6 = vsel %vm352_vm0, %v359_v5, 0.0 }
  0xa8   : > { %361 = vadd.xlane.f32.xlu0 %v360_v6 }
 0x135   : > { %v362_v10 = vpop.xlane.xlu0 %361 }
 0x136   : > { %v363_v11 = vmul.f32 0.03125, %v362_v10 }
 0x138   : > { %v364_v12 = vadd.f32 1e-05, %v363_v11 }
 0x13a   : > { %1235 = vrsqrt.f32 %v364_v12 }
 0x144   : > { %v1236_v13 = vpop.eup %1235 }
 0x145   : > { %v366_v15 = vmul.f32 %v1236_v13, %v358_v4 }
 0x147   : > { %v373_v17 = vmul.f32 %v1177_v14, %v366_v15 }
 0x149   : > { %v380_v18 = vadd.f32 %v1178_v16, %v373_v17 }
 0x14b   : > { %v381_v19 = vpack.c.bf16 %v380_v18, %v380_v18 }
 0x14d   : > { %1196 = vmatmul.mubr.msk.bf16.vlgmr.msra.gmra.mrb[0].mxu0 %vm352_vm0, %v381_v19 }
 0x220   : > { %v442_v21 = vpop.f32.mrb[0].mxu0 }
 0x221   : > { %v443_v22 = vadd.f32 %v1179_v20, %v442_v21  ;;  %v1197_v23 = vpop.f32.mrb[1].mxu0 }
 0x222   : > { %v445_v24 = vpop.f32.mrb[2].mxu0 }
 0x223   : > { %v450_v25 = vpack.c.bf16 %v443_v22, %v443_v22  ;;  %v1198_v26 = vpop.f32.mrb[3].mxu0  ;;  %v448_v27 = vmul.f32 0.35355338, %v443_v22 }
 0x225   : > { %633 = vrot.lane.b32.xlu0 %v450_v25, %s1263_s19  ;;  %629 = vrot.lane.b32.xlu1 %v450_v25, %s1264_s20  ;;  %v449_v28 = vpack.c.bf16 %v448_v27, %v448_v27 }
 0x227   : > { %v464_v46 = vrot.slane %v449_v28, %v1357_v42 }
 0x229   : > { %631 = vrot.lane.b32.xlu1 %v450_v25, %s1265_s21 }
 0x22d   : > { %635 = vrot.lane.b32.xlu1 %v450_v25, %s1266_s22 }
 0x231   : > { %813 = vrot.lane.b32.xlu1 %v450_v25, %s1267_s23 }
 0x235   : > { %452 = vrot.lane.b32.xlu1 %v449_v28, %s1264_s20 }
 0x239   : > { %454 = vrot.lane.b32.xlu1 %v449_v28, %s1265_s21 }
 0x23d   : > { %456 = vrot.lane.b32.xlu1 %v449_v28, %s1263_s19 }
 0x297   : > { %v634_v29 = vpop.permute.xlu0 %633  ;;  %v630_v30 = vpop.permute.xlu1 %629 }
 0x298   : > { %641 = vrot.lane.b32.xlu0 %v634_v29, %s1266_s22  ;;  %637 = vrot.lane.b32.xlu1 %v630_v30, %s1266_s22 }
 0x29b   : > { %v632_v31 = vpop.permute.xlu1 %631 }
 0x29c   : > { %815 = vrot.lane.b32.xlu0 %v630_v30, %s1267_s23  ;;  %639 = vrot.lane.b32.xlu1 %v632_v31, %s1266_s22 }
 0x29f   : > { %v1353_v32 = vpop.permute.xlu1 %635 }
 0x2a0   : > { %819 = vrot.lane.b32.xlu0 %v634_v29, %s1267_s23  ;;  %817 = vrot.lane.b32.xlu1 %v632_v31, %s1267_s23 }
 0x2a3   : > { %v1355_v36 = vpop.permute.xlu1 %813 }
 0x2a7   : > { %v453_v41 = vpop.permute.xlu1 %452 }
 0x2a8   : > { %v498_v53 = vrot.slane %v453_v41, %v1357_v42 }
 0x2ab   : > { %v455_v44 = vpop.permute.xlu1 %454 }
 0x2ac   : > { %v472_v47 = vrot.slane %v455_v44, %v1357_v42 }
 0x2ae   : > { %v473_v48 = vcombine.low %v464_v46, %v472_v47  ;;  %v474_v49 = vcombine.high %v464_v46, %v472_v47 }
 0x2af   : > { %v457_v50 = vpop.permute.xlu1 %456 }
 0x2b0   : > { %v481_v51 = vrot.slane %v473_v48, %v1359_v45  ;;  %v506_v52 = vrot.slane %v457_v50, %v1357_v42  ;;  %v488_v54 = vrot.slane %v474_v49, %v1359_v45 }
 0x2b2   : > { %v507_v55 = vcombine.low %v498_v53, %v506_v52  ;;  %v508_v56 = vcombine.high %v498_v53, %v506_v52  ;;  %v489_v58 = vcombine.high %v481_v51, %v1270_v57  ;;  %v490_v61 = vcombine.high %v488_v54, %v1270_v57 }
 0x2b3   : > { %v529_v62 = vshrl.u32 %v481_v51, 16  ;;  %v545_v4 = vshrl.u32 %v488_v54, 16  ;;  %v650_v53 = vrot.slane %v1353_v32, %v1357_v42 }
 0x2b4   : > { %v515_v59 = vrot.slane %v507_v55, %v1359_v45  ;;  %v522_v60 = vrot.slane %v508_v56, %v1359_v45  ;;  %v537_v3 = vshrl.u32 %v489_v58, 16  ;;  %v553_v11 = vshrl.u32 %v490_v61, 16 }
 0x2b5   : > { %v828_v56 = vrot.slane %v1355_v36, %v1357_v42 }
 0x2b6   : > { %v523_v63 = vcombine.high %v515_v59, %v1270_v57  ;;  %v524_v0 = vcombine.high %v522_v60, %v1270_v57  ;;  %v527_v1 = vpack.i.b16 %v515_v59, %v481_v51  ;;  %v530_v2 = vshrl.u32 %v515_v59, 16 }
 0x2b7   : > { %v543_v5 = vpack.i.b16 %v522_v60, %v488_v54  ;;  %v546_v6 = vshrl.u32 %v522_v60, 16 }
 0x2b8   : > { %v531_v7 = vpack.i.b16 %v530_v2, %v529_v62  ;;  %v535_v8 = vpack.i.b16 %v523_v63, %v489_v58  ;;  %v538_v9 = vshrl.u32 %v523_v63, 16  ;;  %v551_v10 = vpack.i.b16 %v524_v0, %v490_v61 }
 0x2b9   : > { %v547_v12 = vpack.i.b16 %v546_v6, %v545_v4  ;;  %v554_v13 = vshrl.u32 %v524_v0, 16  ;;  %v557_v14 = vcombine.low %v527_v1, %v543_v5 }
 0x2ba   : > { %v539_v15 = vpack.i.b16 %v538_v9, %v537_v3  ;;  %v565_v16 = vcombine.low %v535_v8, %v551_v10 }
 0x2bb   : > { %v555_v17 = vpack.i.b16 %v554_v13, %v553_v11  ;;  %v582_v18 = vcombine.low %v531_v7, %v547_v12  ;;  %v564_v19 = vrot.slane %v557_v14, %v1357_v42 }
 0x2bc   : > { %v572_v20 = vrot.slane %v565_v16, %v1357_v42 }
 0x2bd   : > { %v590_v21 = vcombine.low %v539_v15, %v555_v17  ;;  %v589_v23 = vrot.slane %v582_v18, %v1357_v42 }
 0x2be   : > { %v573_v22 = vcombine.low %v564_v19, %v572_v20 }
 0x2bf   : > { %v597_v24 = vrot.slane %v590_v21, %v1357_v42 }
 0x2c0   : > { %v580_v25 = vrot.slane %v573_v22, %v1359_v45 }
 0x2c1   : > { %v598_v26 = vcombine.low %v589_v23, %v597_v24 }
 0x2c2   : > { %v581_v27 = vcombine.high %v580_v25, %v1270_v57  ;;  %v611_v31 = vshrl.u32 %v580_v25, 16 }
 0x2c3   : > { %v605_v28 = vrot.slane %v598_v26, %v1359_v45 }
 0x2c4   : > { %v619_v37 = vshrl.u32 %v581_v27, 16 }
 0x2c5   : > { %v606_v29 = vcombine.high %v605_v28, %v1270_v57  ;;  %v609_v30 = vpack.i.b16 %v605_v28, %v580_v25  ;;  %v612_v33 = vshrl.u32 %v605_v28, 16 }
 0x2c7   : > { %v613_v34 = vpack.i.b16 %v612_v33, %v611_v31  ;;  %v617_v35 = vpack.i.b16 %v606_v29, %v581_v27  ;;  %v620_v38 = vshrl.u32 %v606_v29, 16  ;;  %624 = vst.msk [vmem:[%s331_s8] sm:$0xf] %vm623_vm2, %v609_v30 }
 0x2c9   : > { %v621_v39 = vpack.i.b16 %v620_v38, %v619_v37  ;;  %625 = vst.msk [vmem:[%s331_s8 + $0x4] sm:$0xf] %vm623_vm2, %v613_v34  ;;  %626 = vst.msk [vmem:[%s331_s8 + $0x8] sm:$0xf] %vm623_vm2, %v617_v35 }
 0x2cb   : > { %627 = vst.msk [vmem:[%s331_s8 + $0xc] sm:$0xf] %vm623_vm2, %v621_v39 }
 0x30a   : > { %v642_v40 = vpop.permute.xlu0 %641  ;;  %v638_v41 = vpop.permute.xlu1 %637 }
 0x30b   : > { %v692_v43 = vrot.slane %v642_v40, %v1357_v42  ;;  %v684_v44 = vrot.slane %v638_v41, %v1357_v42 }
 0x30d   : > { %v693_v46 = vcombine.low %v684_v44, %v692_v43  ;;  %v694_v47 = vcombine.high %v684_v44, %v692_v43 }
 0x30e   : > { %v816_v48 = vpop.permute.xlu0 %815  ;;  %v640_v49 = vpop.permute.xlu1 %639 }
 0x30f   : > { %v701_v50 = vrot.slane %v693_v46, %v1359_v45  ;;  %v708_v51 = vrot.slane %v694_v47, %v1359_v45  ;;  %v658_v52 = vrot.slane %v640_v49, %v1357_v42  ;;  %v862_v58 = vrot.slane %v816_v48, %v1357_v42 }
 0x311   : > { %v709_v54 = vcombine.high %v701_v50, %v1270_v57  ;;  %v710_v55 = vcombine.high %v708_v51, %v1270_v57  ;;  %v659_v59 = vcombine.low %v650_v53, %v658_v52  ;;  %v660_v60 = vcombine.high %v650_v53, %v658_v52 }
 0x312   : > { %v820_v61 = vpop.permute.xlu0 %819  ;;  %v818_v62 = vpop.permute.xlu1 %817  ;;  %v716_v63 = vshrl.u32 %v701_v50, 16  ;;  %v732_v0 = vshrl.u32 %v708_v51, 16 }
 0x313   : > { %v870_v1 = vrot.slane %v820_v61, %v1357_v42  ;;  %v836_v2 = vrot.slane %v818_v62, %v1357_v42  ;;  %v724_v32 = vshrl.u32 %v709_v54, 16  ;;  %v740_v3 = vshrl.u32 %v710_v55, 16 }
 0x314   : > { %v667_v4 = vrot.slane %v659_v59, %v1359_v45  ;;  %v674_v5 = vrot.slane %v660_v60, %v1359_v45 }
 0x315   : > { %v871_v6 = vcombine.low %v862_v58, %v870_v1  ;;  %v872_v36 = vcombine.high %v862_v58, %v870_v1  ;;  %v837_v7 = vcombine.low %v828_v56, %v836_v2  ;;  %v838_v8 = vcombine.high %v828_v56, %v836_v2 }
 0x316   : > { %v675_v9 = vcombine.high %v667_v4, %v1270_v57  ;;  %v676_v10 = vcombine.high %v674_v5, %v1270_v57  ;;  %v713_v11 = vpack.i.b16 %v701_v50, %v667_v4  ;;  %v715_v12 = vshrl.u32 %v667_v4, 16 }
 0x317   : > { %v729_v13 = vpack.i.b16 %v708_v51, %v674_v5  ;;  %v731_v14 = vshrl.u32 %v674_v5, 16  ;;  %v879_v15 = vrot.slane %v871_v6, %v1359_v45  ;;  %v886_v16 = vrot.slane %v872_v36, %v1359_v45 }
 0x318   : > { %v717_v17 = vpack.i.b16 %v716_v63, %v715_v12  ;;  %v721_v18 = vpack.i.b16 %v709_v54, %v675_v9  ;;  %v723_v19 = vshrl.u32 %v675_v9, 16  ;;  %v737_v20 = vpack.i.b16 %v710_v55, %v676_v10 }
 0x319   : > { %v733_v21 = vpack.i.b16 %v732_v0, %v731_v14  ;;  %v739_v22 = vshrl.u32 %v676_v10, 16  ;;  %v743_v23 = vcombine.low %v713_v11, %v729_v13  ;;  %v887_v24 = vcombine.high %v879_v15, %v1270_v57 }
 0x31a   : > { %v725_v25 = vpack.i.b16 %v724_v32, %v723_v19  ;;  %v751_v26 = vcombine.low %v721_v18, %v737_v20  ;;  %v888_v27 = vcombine.high %v886_v16, %v1270_v57  ;;  %v894_v31 = vshrl.u32 %v879_v15, 16 }
 0x31b   : > { %v741_v28 = vpack.i.b16 %v740_v3, %v739_v22  ;;  %v750_v29 = vrot.slane %v743_v23, %v1357_v42  ;;  %v768_v30 = vcombine.low %v717_v17, %v733_v21  ;;  %v902_v34 = vshrl.u32 %v887_v24, 16 }
 0x31c   : > { %v758_v33 = vrot.slane %v751_v26, %v1357_v42  ;;  %v910_v35 = vshrl.u32 %v886_v16, 16  ;;  %v845_v37 = vrot.slane %v837_v7, %v1359_v45  ;;  %v918_v40 = vshrl.u32 %v888_v27, 16 }
 0x31d   : > { %v775_v38 = vrot.slane %v768_v30, %v1357_v42  ;;  %v776_v39 = vcombine.low %v725_v25, %v741_v28  ;;  %v852_v41 = vrot.slane %v838_v8, %v1359_v45 }
 0x31e   : > { %v759_v43 = vcombine.low %v750_v29, %v758_v33  ;;  %v853_v44 = vcombine.high %v845_v37, %v1270_v57  ;;  %v891_v46 = vpack.i.b16 %v879_v15, %v845_v37  ;;  %v893_v47 = vshrl.u32 %v845_v37, 16 }
 0x31f   : > { %v783_v48 = vrot.slane %v776_v39, %v1357_v42  ;;  %v854_v49 = vcombine.high %v852_v41, %v1270_v57  ;;  %v907_v50 = vpack.i.b16 %v886_v16, %v852_v41  ;;  %v909_v51 = vshrl.u32 %v852_v41, 16 }
 0x320   : > { %v766_v52 = vrot.slane %v759_v43, %v1359_v45  ;;  %v895_v53 = vpack.i.b16 %v894_v31, %v893_v47  ;;  %v899_v54 = vpack.i.b16 %v887_v24, %v853_v44  ;;  %v901_v55 = vshrl.u32 %v853_v44, 16 }
 0x321   : > { %v784_v56 = vcombine.low %v775_v38, %v783_v48  ;;  %v911_v58 = vpack.i.b16 %v910_v35, %v909_v51  ;;  %v915_v59 = vpack.i.b16 %v888_v27, %v854_v49  ;;  %v917_v60 = vshrl.u32 %v854_v49, 16 }
 0x322   : > { %v767_v61 = vcombine.high %v766_v52, %v1270_v57  ;;  %v903_v62 = vpack.i.b16 %v902_v34, %v901_v55  ;;  %v921_v63 = vcombine.low %v891_v46, %v907_v50  ;;  %v797_v32 = vshrl.u32 %v766_v52, 16 }
 0x323   : > { %v791_v0 = vrot.slane %v784_v56, %v1359_v45  ;;  %v919_v1 = vpack.i.b16 %v918_v40, %v917_v60  ;;  %v929_v2 = vcombine.low %v899_v54, %v915_v59  ;;  %v946_v4 = vcombine.low %v895_v53, %v911_v58 }
 0x324   : > { %v928_v3 = vrot.slane %v921_v63, %v1357_v42  ;;  %v805_v8 = vshrl.u32 %v767_v61, 16 }
 0x325   : > { %v792_v5 = vcombine.high %v791_v0, %v1270_v57  ;;  %v795_v6 = vpack.i.b16 %v791_v0, %v766_v52  ;;  %v798_v36 = vshrl.u32 %v791_v0, 16  ;;  %v936_v7 = vrot.slane %v929_v2, %v1357_v42 }
 0x326   : > { %v954_v9 = vcombine.low %v903_v62, %v919_v1  ;;  %v953_v14 = vrot.slane %v946_v4, %v1357_v42 }
 0x327   : > { %v799_v10 = vpack.i.b16 %v798_v36, %v797_v32  ;;  %v803_v11 = vpack.i.b16 %v792_v5, %v767_v61  ;;  %v806_v12 = vshrl.u32 %v792_v5, 16  ;;  %809 = vst.msk [vmem:[%s339_s10] sm:$0xf] %vm623_vm2, %v795_v6  ;;  %v937_v13 = vcombine.low %v928_v3, %v936_v7 }
 0x328   : > { %v961_v15 = vrot.slane %v954_v9, %v1357_v42 }
 0x329   : > { %v807_v16 = vpack.i.b16 %v806_v12, %v805_v8  ;;  %810 = vst.msk [vmem:[%s339_s10 + $0x4] sm:$0xf] %vm623_vm2, %v799_v10  ;;  %811 = vst.msk [vmem:[%s339_s10 + $0x8] sm:$0xf] %vm623_vm2, %v803_v11  ;;  %v944_v17 = vrot.slane %v937_v13, %v1359_v45 }
 0x32a   : > { %v962_v18 = vcombine.low %v953_v14, %v961_v15 }
 0x32b   : > { %812 = vst.msk [vmem:[%s339_s10 + $0xc] sm:$0xf] %vm623_vm2, %v807_v16  ;;  %v945_v19 = vcombine.high %v944_v17, %v1270_v57  ;;  %v975_v22 = vshrl.u32 %v944_v17, 16 }
 0x32c   : > { %v969_v20 = vrot.slane %v962_v18, %v1359_v45 }
 0x32d   : > { %v983_v26 = vshrl.u32 %v945_v19, 16 }
 0x32e   : > { %v970_v42 = vcombine.high %v969_v20, %v1270_v57  ;;  %v973_v21 = vpack.i.b16 %v969_v20, %v944_v17  ;;  %v976_v23 = vshrl.u32 %v969_v20, 16 }
 0x330   : > { %v977_v24 = vpack.i.b16 %v976_v23, %v975_v22  ;;  %v981_v25 = vpack.i.b16 %v970_v42, %v945_v19  ;;  %v984_v27 = vshrl.u32 %v970_v42, 16  ;;  %987 = vst.msk [vmem:[%s347_s13] sm:$0xf] %vm623_vm2, %v973_v21 }
 0x332   : > { %v985_v28 = vpack.i.b16 %v984_v27, %v983_v26  ;;  %988 = vst.msk [vmem:[%s347_s13 + $0x4] sm:$0xf] %vm623_vm2, %v977_v24  ;;  %989 = vst.msk [vmem:[%s347_s13 + $0x8] sm:$0xf] %vm623_vm2, %v981_v25 }
 0x334   : > { %990 = vst.msk [vmem:[%s347_s13 + $0xc] sm:$0xf] %vm623_vm2, %v985_v28 }
 0x335 PF: > { %s18_s26 = sadd.s32 1, %s1259_s26   ;;  %s1467_s24 = smov %s1255_s25 }
 0x336   : > { %p15_p5 = scmp.ge.s32.totalorder %s18_s26, 4   ;;  %s1468_s25 = smov %s1470_s27 }
 0x338   :  { %17 = sbr.rel (!%p15_p5) target bundleno = 2 (0x2), region = 94 }

// kernel: msk_forward.23
= control target key start
LH: loop header
LB: loop body
LE: loop exit
PB: predicated region body
PF: predicated region fallthrough
CT: control target
= control target key end

     0   :  { %s2367_s0 = inlined_call_operand.vmem [shape: f32[2,8,32], index: 0, kind: input, shape index: {}]   ;;  %s2368_s1 = inlined_call_operand.vmem [shape: bf16[2,4,8,8], index: 1, kind: input, shape index: {}]   ;;  %s2369_s2 = inlined_call_operand.vmem [shape: bf16[2,4,8,8], index: 2, kind: input, shape index: {}]   ;;  %s2370_s3 = inlined_call_operand.vmem [shape: bf16[2,4,8,8], index: 3, kind: input, shape index: {}]   ;;  %s2371_s4 = inlined_call_operand.vmem [shape: f32[8,8], index: 4, kind: input, shape index: {}]   ;;  %s2372_s5 = inlined_call_operand.vmem [shape: bf16[32,32], index: 5, kind: input, shape index: {}]   ;;  %s2373_s6 = inlined_call_operand.vmem [shape: f32[1,32], index: 6, kind: input, shape index: {}]   ;;  %s2374_s7 = inlined_call_operand.vmem [shape: f32[1,32], index: 7, kind: input, shape index: {}]   ;;  %s2375_s8 = inlined_call_operand.vmem [shape: f32[1,32], index: 8, kind: input, shape index: {}]   ;;  %s2376_s9 = inlined_call_operand.vmem [shape: bf16[32,128], index: 9, kind: input, shape index: {}]   ;;  %s2377_s10 = inlined_call_operand.vmem [shape: f32[1,128], index: 10, kind: input, shape index: {}]   ;;  %s2378_s11 = inlined_call_operand.vmem [shape: bf16[128,32], index: 11, kind: input, shape index: {}]   ;;  %s2379_s12 = inlined_call_operand.vmem [shape: f32[1,32], index: 12, kind: input, shape index: {}]   ;;  %s2380_s13 = inlined_call_operand.vmem [shape: f32[1,32], index: 13, kind: input, shape index: {}]   ;;  %s2381_s14 = inlined_call_operand.vmem [shape: f32[1,32], index: 14, kind: input, shape index: {}]   ;;  %s2382_s15 = inlined_call_operand.hbm [shape: f32[2,8,32], index: 15, kind: output, shape index: {}]  }
   0x1   :  { %2385 = sst [smem:[#allocation8_spill]] %s2367_s0 }
   0x2   :  { %2386 = sst [smem:[#allocation9_spill]] %s2368_s1 }
   0x3   :  { %2387 = sst [smem:[#allocation10_spill]] %s2369_s2 }
   0x4   :  { %2388 = sst [smem:[#allocation11_spill]] %s2370_s3 }
   0x5   :  { %20 = vsyncpa [#allocation3], 0 }
   0x6   :  { %22 = vsyncpa [#allocation3 + $0x1], 0  ;;  %s2102_s18 = smov 0   ;;  %s2104_s19 = smov 0  }
   0x7   :  { %s2106_s20 = smov 0   ;;  %s2108_s21 = smov 0  }
   0x8   :  { %s2110_s22 = smov 0   ;;  %s2112_s23 = smov 0  }
   0x9 LB: > { %2389 = sst [smem:[#allocation5_spill]] %s2007_s22  ;;  %s1671_s24 = sadd.s32 4294967295, %s2011_s23   ;;  %s2011_s23 = sphi %s2112_s23, %s28_s23   ;;  %s2007_s22 = sphi %s2110_s22, %s2400_s22   ;;  %s2003_s21 = sphi %s2108_s21, %s2399_s21   ;;  %s1999_s20 = sphi %s2106_s20, %s2403_s20   ;;  %s1995_s19 = sphi %s2104_s19, %s2402_s19   ;;  %s1991_s18 = sphi %s2102_s18, %s2401_s18  }
   0xa   : > { %s1672_s25 = sadd.s32 4294967294, %s2011_s23   ;;  %s40_s26 = sadd.s32 1, %s2007_s22 }
   0xb   : > { %s393_s27 = sadd.s32 1, %s1999_s20  ;;  %p42_p0 = scmp.ge.s32.totalorder %s40_s26, 2 }
   0xc   : > { %p403_p1 = scmp.ne.s32.totalorder %s1999_s20, %s1995_s19  ;;  %p404_p2 = scmp.eq.s32.totalorder %s1671_s24, 1 }
   0xd   : > { %p409_p3 = scmp.ne.s32.totalorder %s1995_s19, %s1991_s18  ;;  %s2405_s26 = smov (%p42_p0, %s40_s26), 0 }
   0xe   : > { %2390 = sst [smem:[#allocation6_spill]] %s2405_s26  ;;  %p2142_p4 = por %p404_p2, %p403_p1 }
   0xf   : > { %p410_p5 = scmp.eq.s32.totalorder %s1672_s25, 1  ;;  %s388_s29 = ssub.s32 %s2007_s22, %s2405_s26 }
  0x10   : > { %p1676_p6 = scmp.ge.s32.totalorder %s2011_s23, 1  ;;  %p391_p7 = scmp.eq.s32.totalorder %s388_s29, 0 }
  0x11   : > { %p2149_p8 = por %p410_p5, %p409_p3  ;;  %p502_p9 = scmp.lt.s32.totalorder %s2011_s23, 3 }
  0x12   : > { %s2155_s16 = scalar_select %p391_p7, %s1999_s20, %s393_s27  }
  0x13   : > { %p503_p10 = pnand %p1676_p6, %p502_p9 }
  0x14   : > { %2393 = sst [smem:[#allocation7_spill]] %s2155_s16  ;;  %p574_p11 = scmp.lt.s32.totalorder (!%p503_p10), %s2003_s21, 1  ;;  %v2013_v0 = vmov (!%p503_p10), 0.0   ;;  %vm2014_vm0 = vmmov (!%p503_p10), 0   ;;  %vm618_vm1 = vcmask (!%p503_p10), 64512   ;;  %v617_v13 = vld [vmem:[%s2371_s4] sm:$0xff] (!%p503_p10) }
  0x15   : > { %506 = sbr.rel (%p503_p10) target bundleno = 2267 (0x8db), region = 80  ;;  %1752 = vmatprep.subr.bf16.mxu1 (!%p503_p10), %v2013_v0  ;;  %1754 = vmatprep.mubr.msk.bf16.mxu1 (!%p503_p10), %vm2014_vm0, %v2013_v0  ;;  %s2394_s2 = sld [smem:[#allocation10_spill]] (!%p503_p10)  ;;  %vm854_vm2 = vcmask (!%p503_p10), 1043456   ;;  %vm1207_vm3 = vcmask (!%p503_p10), 130048   ;;  %vm1210_vm4 = vcmask (!%p503_p10), 195584   ;;  %vm1236_vm5 = vcmask (!%p503_p10), 261120  }
  0x16   : > { %1776 = vmatprep.subr.bf16.mxu0 (!%p503_p10), %v2013_v0  ;;  %1778 = vmatprep.mubr.msk.bf16.mxu0 (!%p503_p10), %vm2014_vm0, %v2013_v0  ;;  %s2395_s1 = sld [smem:[#allocation9_spill]] (!%p503_p10)  ;;  %s2396_s3 = sld [smem:[#allocation11_spill]] (!%p503_p10) }
  0x17   : > { %s2019_s25 = smov (!%p503_p10), 16   ;;  %s2397_s0 = sld [smem:[#allocation8_spill]] (!%p503_p10) }
  0x18   : > { %s571_s22 = sand.u32 (!%p503_p10), 1, %s1995_s19  }
  0x1c   : > { %s2162_s17 = scalar_select %p574_p11, %s2003_s21, 1 }
  0x1e   : > { %s2168_s24 = sshll.u32 %s2162_s17, 4 }
  0x1f   : > { %s593_s29 = scalar_lea.vmem %s2394_s2, %s2168_s24  ;;  %s588_s16 = scalar_lea.vmem %s2395_s1, %s2168_s24 }
  0x20   : > { %v609_v1 = vld [vmem:[%s593_s29] sm:$0xf]  ;;  %v610_v3 = vld [vmem:[%s593_s29 + $0x4] sm:$0xf]  ;;  %v611_v6 = vld [vmem:[%s593_s29 + $0x8] sm:$0xf]  ;;  %s598_s27 = scalar_lea.vmem %s2396_s3, %s2168_s24 }
  0x21   : > { %v623_v2 = vsel %vm618_vm1, %v609_v1, 0  ;;  %v605_v4 = vld [vmem:[%s588_s16] sm:$0xf]  ;;  %v669_v5 = vsel %vm618_vm1, %v610_v3, 0  ;;  %v606_v7 = vld [vmem:[%s588_s16 + $0x4] sm:$0xf] }
  0x22   : > { %1753 = vmatpush3.bf16.xpose.msra.mxu1 %v623_v2  ;;  %v715_v8 = vsel %vm618_vm1, %v611_v6, 0  ;;  %v612_v9 = vld [vmem:[%s593_s29 + $0xc] sm:$0xf]  ;;  %v607_v10 = vld [vmem:[%s588_s16 + $0x8] sm:$0xf]  ;;  %s1678_s24 = sshll.u32 %s2162_s17, 3 }
  0x23   : > { %1758 = vmatprep.subr.bf16.mxu1 %v2013_v0  ;;  %v761_v11 = vsel %vm618_vm1, %v612_v9, 0  ;;  %v608_v12 = vld [vmem:[%s588_s16 + $0xc] sm:$0xf]  ;;  %v613_v58 = vld [vmem:[%s598_s27] sm:$0xf]  ;;  %s2018_s16 = smov 8   ;;  %s580_s26 = scalar_lea.vmem %s2397_s0, %s1678_s24 }
  0x24   : > { %v856_v59 = vsel %vm854_vm2, %v613_v58, 0  ;;  %v614_v60 = vld [vmem:[%s598_s27 + $0x4] sm:$0xf]  ;;  %v615_v62 = vld [vmem:[%s598_s27 + $0x8] sm:$0xf]  ;;  %s1715_s24 = sshll.u32 %s2003_s21, 7 }
  0x25   : > { %1777 = vmatpush3.bf16.msra.mxu0 %v856_v59  ;;  %v902_v61 = vsel %vm854_vm2, %v614_v60, 0  ;;  %v948_v63 = vsel %vm854_vm2, %v615_v62, 0  ;;  %v616_v1 = vld [vmem:[%s598_s27 + $0xc] sm:$0xf]  ;;  %v2017_v60 = vmov 0   ;;  %s2020_s27 = smov 24   ;;  %s2319_s3 = scalar_lea.hbm %s2382_s15, %s1715_s24 }
  0x26   : > { %1788 = vmatprep.subr.bf16.mxu0 %v2013_v0  ;;  %v994_v2 = vsel %vm854_vm2, %v616_v1, 0  ;;  %s2021_s21 = smov [#allocation2]  }
  0x29   : > { %1755 = vmatmul.mubr.msk.bf16.vlgmr.msra.gmra.mrb[0].mxu1 %vm618_vm1, %v605_v4 }
  0x2a   : > { %1759 = vmatpush3.bf16.xpose.msra.mxu1 %v669_v5  ;;  %1760 = vmatprep.mubr.msk.bf16.mxu1 %vm2014_vm0, %v2013_v0 }
  0x2b   : > { %1764 = vmatprep.subr.bf16.mxu1 %v2013_v0 }
  0x31   : > { %1761 = vmatmul.mubr.msk.bf16.vlgmr.msra.gmra.mrb[4].mxu1 %vm618_vm1, %v606_v7 }
  0x32   : > { %1765 = vmatpush3.bf16.xpose.msra.mxu1 %v715_v8  ;;  %1766 = vmatprep.mubr.msk.bf16.mxu1 %vm2014_vm0, %v2013_v0 }
  0x33   : > { %1770 = vmatprep.subr.bf16.mxu1 %v2013_v0 }
  0x39   : > { %1767 = vmatmul.mubr.msk.bf16.vlgmr.msra.gmra.mrb[8].mxu1 %vm618_vm1, %v607_v10 }
  0x3a   : > { %1771 = vmatpush3.bf16.xpose.msra.mxu1 %v761_v11  ;;  %1772 = vmatprep.mubr.msk.bf16.mxu1 %vm2014_vm0, %v2013_v0 }
  0x3b   : > { %1782 = vmatprep.subr.bf16.mxu1 %v2013_v0 }
  0x41   : > { %1773 = vmatmul.mubr.msk.bf16.vlgmr.msra.gmra.mrb[12].mxu1 %vm618_vm1, %v608_v12 }
  0x42   : > { %1784 = vmatprep.mubr.msk.bf16.mxu1 %vm2014_vm0, %v2013_v0  ;;  %1783 = vmatpush3.bf16.msra.mxu1 %v902_v61 }
  0x43   : > { %1794 = vmatprep.subr.bf16.mxu1 %v2013_v0 }
  0xfc   : > { %v659_v14 = vpop.f32.mrb[0].mxu1 }
  0xfd   : > { %v660_v15 = vadd.f32 %v659_v14, %v617_v13  ;;  %v1756_v16 = vpop.f32.mrb[1].mxu1 }
  0xfe   : > { %v662_v17 = vpop.f32.mrb[2].mxu1 }
  0xff   : > { %v1757_v18 = vpop.f32.mrb[3].mxu1  ;;  %v803_v19 = vsel %vm618_vm1, %v660_v15, -inf }
 0x100   : > { %804 = vmax.xlane.f32.xlu0 %v803_v19  ;;  %v1899_v19 = vld [vmem:[%s2372_s5] sm:$0xff]  }
 0x104   : > { %v705_v20 = vpop.f32.mrb[4].mxu1 }
 0x105   : > { %v706_v21 = vadd.f32 %v705_v20, %v617_v13  ;;  %v1762_v22 = vpop.f32.mrb[5].mxu1 }
 0x106   : > { %v708_v23 = vpop.f32.mrb[6].mxu1 }
 0x107   : > { %v1763_v24 = vpop.f32.mrb[7].mxu1  ;;  %v806_v25 = vsel %vm618_vm1, %v706_v21, -inf }
 0x108   : > { %807 = vmax.xlane.f32.xlu0 %v806_v25  ;;  %v2015_v24 = vmov 1983009808  }
 0x109   : > { %v1038_v25 = vunpack.c.l.s4 %v2015_v24 }
 0x10c   : > { %v751_v26 = vpop.f32.mrb[8].mxu1 }
 0x10d   : > { %v752_v27 = vadd.f32 %v751_v26, %v617_v13  ;;  %v1768_v28 = vpop.f32.mrb[9].mxu1  ;;  %v1040_v26 = vlaneseq }
 0x10e   : > { %v754_v29 = vpop.f32.mrb[10].mxu1 }
 0x10f   : > { %v1769_v30 = vpop.f32.mrb[11].mxu1  ;;  %v809_v31 = vsel %vm618_vm1, %v752_v27, -inf }
 0x110   : > { %810 = vmax.xlane.f32.xlu1 %v809_v31  ;;  %v1039_v30 = vunpack.c.0.s8 %v1038_v25  ;;  %v1041_v31 = vshrl.u32 %v1040_v26, 7  ;;  %v1900_v25 = vld [vmem:[%s2372_s5 + $0x8] sm:$0xff]  }
 0x114   : > { %v797_v32 = vpop.f32.mrb[12].mxu1 }
 0x115   : > { %v798_v33 = vadd.f32 %v797_v32, %v617_v13  ;;  %v1774_v34 = vpop.f32.mrb[13].mxu1 }
 0x116   : > { %v800_v35 = vpop.f32.mrb[14].mxu1  ;;  %v1042_v34 = vsub.s32 %v1039_v30, %v1041_v31 }
 0x117   : > { %v1775_v36 = vpop.f32.mrb[15].mxu1  ;;  %v812_v37 = vsel %vm618_vm1, %v798_v33, -inf  ;;  %v2016_v35 = vmov 1934713408  }
 0x118   : > { %813 = vmax.xlane.f32.xlu1 %v812_v37  ;;  %v1055_v36 = vunpack.c.l.s4 %v2016_v35 }
 0x18d   : > { %v805_v38 = vpop.xlane.xlu0 %804 }
 0x18e   : > { %v815_v39 = vsub.f32 %v660_v15, %v805_v38 }
 0x190   : > { %v819_v40 = vmul.f32 1.442695, %v815_v39 }
 0x192   : > { %1911 = vpow2.f32 %v819_v40 }
 0x195   : > { %v808_v41 = vpop.xlane.xlu0 %807 }
 0x196   : > { %v816_v42 = vsub.f32 %v706_v21, %v808_v41 }
 0x198   : > { %v821_v43 = vmul.f32 1.442695, %v816_v42 }
 0x19a   : > { %1913 = vpow2.f32 %v821_v43  ;;  %v1056_v43 = vunpack.c.0.s8 %v1055_v36 }
 0x19c   : > { %v1912_v44 = vpop.eup %1911 }
 0x19d   : > { %v811_v45 = vpop.xlane.xlu1 %810  ;;  %v827_v46 = vsel %vm618_vm1, %v1912_v44, 0.0 }
 0x19e   : > { %v817_v47 = vsub.f32 %v752_v27, %v811_v45  ;;  %828 = vadd.xlane.f32.xlu0 %v827_v46 }
 0x1a0   : > { %v823_v48 = vmul.f32 1.442695, %v817_v47  ;;  %v1059_v47 = vsub.s32 %v1056_v43, %v1041_v31 }
 0x1a2   : > { %1915 = vpow2.f32 %v823_v48 }
 0x1a4   : > { %v1914_v49 = vpop.eup %1913 }
 0x1a5   : > { %v814_v50 = vpop.xlane.xlu1 %813  ;;  %v830_v51 = vsel %vm618_vm1, %v1914_v49, 0.0 }
 0x1a6   : > { %v818_v52 = vsub.f32 %v798_v33, %v814_v50  ;;  %831 = vadd.xlane.f32.xlu1 %v830_v51 }
 0x1a8   : > { %v825_v53 = vmul.f32 1.442695, %v818_v52 }
 0x1aa   : > { %1917 = vpow2.f32 %v825_v53 }
 0x1ac   : > { %v1916_v54 = vpop.eup %1915 }
 0x1ad   : > { %v833_v55 = vsel %vm618_vm1, %v1916_v54, 0.0 }
 0x1ae   : > { %834 = vadd.xlane.f32.xlu0 %v833_v55 }
 0x1b4   : > { %v1918_v56 = vpop.eup %1917 }
 0x1b5   : > { %v836_v57 = vsel %vm618_vm1, %v1918_v56, 0.0 }
 0x1b6   : > { %837 = vadd.xlane.f32.xlu1 %v836_v57 }
 0x22b   : > { %v829_v3 = vpop.xlane.xlu0 %828 }
 0x22c   : > { %1919 = vrcp.f32 %v829_v3 }
 0x233   : > { %v832_v4 = vpop.xlane.xlu1 %831 }
 0x234   : > { %1921 = vrcp.f32 %v832_v4 }
 0x236   : > { %v1920_v5 = vpop.eup %1919 }
 0x237   : > { %v843_v6 = vmul.f32 %v1920_v5, %v1912_v44 }
 0x239   : > { %v847_v7 = vpack.c.bf16 %v843_v6, %v843_v6 }
 0x23b   : > { %1779 = vmatmul.mubr.msk.bf16.vlgmr.msra.gmra.mrb[0].mxu0 %vm618_vm1, %v847_v7  ;;  %v835_v8 = vpop.xlane.xlu0 %834 }
 0x23c   : > { %1923 = vrcp.f32 %v835_v8  ;;  %1789 = vmatpush3.bf16.msra.mxu0 %v948_v63  ;;  %1790 = vmatprep.mubr.msk.bf16.mxu0 %vm2014_vm0, %v2013_v0 }
 0x23d   : > { %1800 = vmatprep.subr.bf16.mxu0 %v2013_v0 }
 0x23e   : > { %v1922_v9 = vpop.eup %1921 }
 0x23f   : > { %v844_v10 = vmul.f32 %v1922_v9, %v1914_v49 }
 0x241   : > { %v848_v11 = vpack.c.bf16 %v844_v10, %v844_v10 }
 0x243   : > { %1785 = vmatmul.mubr.msk.bf16.vlgmr.msra.gmra.mrb[16].mxu1 %vm618_vm1, %v848_v11  ;;  %v838_v12 = vpop.xlane.xlu1 %837 }
 0x244   : > { %1925 = vrcp.f32 %v838_v12  ;;  %1795 = vmatpush3.bf16.msra.mxu1 %v994_v2  ;;  %1796 = vmatprep.mubr.msk.bf16.mxu1 %vm2014_vm0, %v2013_v0 }
 0x245   : > { %1808 = vmatprep.subr.bf16.mxu1 %v2013_v0 }
 0x246   : > { %v1924_v13 = vpop.eup %1923 }
 0x247   : > { %v845_v14 = vmul.f32 %v1924_v13, %v1916_v54 }
 0x249   : > { %v849_v15 = vpack.c.bf16 %v845_v14, %v845_v14 }
 0x24b   : > { %1791 = vmatmul.mubr.msk.bf16.vlgmr.msra.gmra.mrb[4].mxu0 %vm618_vm1, %v849_v15 }
 0x24c   : > { %1804 = vmatprep.mubr.msk.bf16.mxu0 %vm2014_vm0, %v2013_v0  ;;  %1801 = vmatpush3.bf16.msra.mxu0 %v1899_v19 }
 0x24d   : > { %1802 = vmatprep.subr.bf16.mxu0 %v2013_v0 }
 0x24e   : > { %v1926_v16 = vpop.eup %1925 }
 0x24f   : > { %v846_v17 = vmul.f32 %v1926_v16, %v1918_v56 }
 0x250   : > { %1803 = vmatpush3.bf16.msra.mxu0 %v1900_v25 }
 0x251   : > { %v850_v18 = vpack.c.bf16 %v846_v17, %v846_v17  ;;  %1816 = vmatprep.subr.bf16.mxu0 %v2013_v0 }
 0x253   : > { %1797 = vmatmul.mubr.msk.bf16.vlgmr.msra.gmra.mrb[20].mxu1 %vm618_vm1, %v850_v18 }
 0x254   : > { %1812 = vmatprep.mubr.msk.bf16.mxu1 %vm2014_vm0, %v2013_v0 }
 0x30e   : > { %v892_v20 = vpop.f32.mrb[0].mxu0 }
 0x30f   : > { %v1780_v21 = vpop.f32.mrb[1].mxu0  ;;  %v1036_v33 = vpack.c.bf16 %v892_v20, %v892_v20 }
 0x310   : > { %v895_v22 = vpop.f32.mrb[2].mxu0 }
 0x311   : > { %v1781_v23 = vpop.f32.mrb[3].mxu0  ;;  %v1043_v41 = vrot.slane %v1036_v33, %v1042_v34 }
 0x316   : > { %v938_v27 = vpop.f32.mrb[16].mxu1 }
 0x317   : > { %v1786_v28 = vpop.f32.mrb[17].mxu1  ;;  %v1070_v48 = vpack.c.bf16 %v938_v27, %v938_v27 }
 0x318   : > { %v941_v29 = vpop.f32.mrb[18].mxu1 }
 0x319   : > { %v1787_v32 = vpop.f32.mrb[19].mxu1  ;;  %v1077_v55 = vrot.slane %v1070_v48, %v1042_v34 }
 0x31e   : > { %v984_v37 = vpop.f32.mrb[4].mxu0 }
 0x31f   : > { %v1044_v38 = vpack.c.bf16 %v984_v37, %v984_v37  ;;  %v1792_v39 = vpop.f32.mrb[5].mxu0 }
 0x320   : > { %v987_v40 = vpop.f32.mrb[6].mxu0 }
 0x321   : > { %v1051_v42 = vrot.slane %v1044_v38, %v1042_v34  ;;  %v1793_v44 = vpop.f32.mrb[7].mxu0 }
 0x323   : > { %v1052_v45 = vcombine.low %v1043_v41, %v1051_v42  ;;  %v1053_v46 = vcombine.high %v1043_v41, %v1051_v42 }
 0x325   : > { %v1060_v53 = vrot.slane %v1052_v45, %v1059_v47  ;;  %v1067_v57 = vrot.slane %v1053_v46, %v1059_v47 }
 0x326   : > { %v1030_v49 = vpop.f32.mrb[20].mxu1 }
 0x327   : > { %v1798_v50 = vpop.f32.mrb[21].mxu1  ;;  %v1078_v51 = vpack.c.bf16 %v1030_v49, %v1030_v49  ;;  %v1068_v61 = vcombine.high %v1060_v53, %v2017_v60  ;;  %v1069_v1 = vcombine.high %v1067_v57, %v2017_v60  ;;  %v1108_v2 = vshrl.u32 %v1060_v53, 16  ;;  %v1693_v49 = vld [vmem:[%s2373_s6] ss:$0 sm:$0xff] }
 0x328   : > { %v1033_v52 = vpop.f32.mrb[22].mxu1  ;;  %v1124_v8 = vshrl.u32 %v1067_v57, 16  ;;  %v604_v50 = vld [vmem:[%s580_s26] sm:$0xff]  ;;  %s1677_s26 = sshll.u32 %s571_s22, 3 }
 0x329   : > { %v1799_v54 = vpop.f32.mrb[23].mxu1  ;;  %v1085_v56 = vrot.slane %v1078_v51, %v1042_v34  ;;  %v1116_v7 = vshrl.u32 %v1068_v61, 16  ;;  %v1132_v15 = vshrl.u32 %v1069_v1, 16  ;;  %s573_s29 = scalar_lea.vmem [#allocation2], %s1677_s26  ;;  %s1937_s26 = sshll.u32 %s2021_s21, 4  ;;  %s1938_s26 = int_to_ptr.vmem [resolvable:$false] %s1937_s26 }
 0x32a   : > { %s1543_s0 = sshll.u32 %s573_s29, 4  ;;  %s1939_s17 = scalar_lea.vmem %s1938_s26, 256  ;;  %s2321_s0 = int_to_ptr.vmem [resolvable:$true] %s1543_s0 }
 0x32b   : > { %v1086_v58 = vcombine.low %v1077_v55, %v1085_v56  ;;  %v1087_v59 = vcombine.high %v1077_v55, %v1085_v56  ;;  %p1940_p1 = scmp.lt.s32.totalorder %s2321_s0, %s1938_s26 }
 0x32d   : > { %v1094_v62 = vrot.slane %v1086_v58, %v1059_v47  ;;  %v1101_v63 = vrot.slane %v1087_v59, %v1059_v47 }
 0x32f   : > { %v1102_v3 = vcombine.high %v1094_v62, %v2017_v60  ;;  %v1103_v4 = vcombine.high %v1101_v63, %v2017_v60  ;;  %v1106_v5 = vpack.i.b16 %v1094_v62, %v1060_v53  ;;  %v1109_v6 = vshrl.u32 %v1094_v62, 16 }
 0x330   : > { %v1122_v9 = vpack.i.b16 %v1101_v63, %v1067_v57  ;;  %v1125_v10 = vshrl.u32 %v1101_v63, 16  ;;  %v1901_v63 = vld [vmem:[%s2376_s9] sm:$0xff]  }
 0x331   : > { %v1110_v11 = vpack.i.b16 %v1109_v6, %v1108_v2  ;;  %v1114_v12 = vpack.i.b16 %v1102_v3, %v1068_v61  ;;  %v1117_v13 = vshrl.u32 %v1102_v3, 16  ;;  %v1130_v14 = vpack.i.b16 %v1103_v4, %v1069_v1  ;;  %1809 = vmatpush3.bf16.msra.mxu1 %v1901_v63  ;;  %v1902_v1 = vld [vmem:[%s2376_s9 + $0x8] sm:$0xff]   ;;  %v1903_v2 = vld [vmem:[%s2378_s11] sm:$0xff]  }
 0x332   : > { %v1126_v16 = vpack.i.b16 %v1125_v10, %v1124_v8  ;;  %v1133_v17 = vshrl.u32 %v1103_v4, 16  ;;  %v1136_v18 = vcombine.low %v1106_v5, %v1122_v9  ;;  %1810 = vmatprep.subr.bf16.mxu1 %v2013_v0  ;;  %v1698_v9 = vld [vmem:[%s2375_s8] ss:$0 sm:$0xff] }
 0x333   : > { %v1118_v19 = vpack.i.b16 %v1117_v13, %v1116_v7  ;;  %v1144_v20 = vcombine.low %v1114_v12, %v1130_v14  ;;  %v1697_v7 = vld [vmem:[%s2374_s7] ss:$0 sm:$0xff]  ;;  %v1904_v13 = vld [vmem:[%s2378_s11 + $0x8] sm:$0xff]   ;;  %v1905_v14 = vld [vmem:[%s2378_s11 + $0x10] sm:$0xff]  }
 0x334   : > { %v1134_v21 = vpack.i.b16 %v1133_v17, %v1132_v15  ;;  %v1161_v22 = vcombine.low %v1110_v11, %v1126_v16  ;;  %v1143_v23 = vrot.slane %v1136_v18, %v1042_v34  ;;  %v1906_v15 = vld [vmem:[%s2378_s11 + $0x18] sm:$0xff]   ;;  %v1907_v16 = vld [vmem:[%s2378_s11 + $0x20] sm:$0xff]   ;;  %v1908_v17 = vld [vmem:[%s2378_s11 + $0x28] sm:$0xff]  }
 0x335   : > { %v1151_v24 = vrot.slane %v1144_v20, %v1042_v34  ;;  %1811 = vmatpush3.bf16.msra.mxu1 %v1902_v1  ;;  %v1909_v18 = vld [vmem:[%s2378_s11 + $0x30] sm:$0xff]   ;;  %v1699_v20 = vld [vmem:[%s2377_s10] ss:$0 sm:$0xff] }
 0x336   : > { %v1169_v26 = vcombine.low %v1118_v19, %v1134_v21  ;;  %v1168_v28 = vrot.slane %v1161_v22, %v1042_v34  ;;  %v1910_v19 = vld [vmem:[%s2378_s11 + $0x38] sm:$0xff]  }
 0x337   : > { %v1152_v27 = vcombine.low %v1143_v23, %v1151_v24 }
 0x338   : > { %v1176_v29 = vrot.slane %v1169_v26, %v1042_v34 }
 0x339   : > { %v1159_v30 = vrot.slane %v1152_v27, %v1059_v47 }
 0x33a   : > { %v1177_v31 = vcombine.low %v1168_v28, %v1176_v29 }
 0x33b   : > { %v1160_v33 = vcombine.high %v1159_v30, %v2017_v60  ;;  %v1189_v35 = vshrl.u32 %v1159_v30, 16 }
 0x33c   : > { %v1184_v32 = vrot.slane %v1177_v31, %v1059_v47 }
 0x33d   : > { %v1195_v41 = vshrl.u32 %v1160_v33, 16 }
 0x33e   : > { %v1190_v36 = vshrl.u32 %v1184_v32, 16  ;;  %v1185_v37 = vcombine.high %v1184_v32, %v2017_v60  ;;  %v1188_v38 = vpack.i.b16 %v1184_v32, %v1159_v30 }
 0x340   : > { %v1191_v39 = vpack.i.b16 %v1190_v36, %v1189_v35  ;;  %v1194_v40 = vpack.i.b16 %v1185_v37, %v1160_v33  ;;  %v1196_v42 = vshrl.u32 %v1185_v37, 16  ;;  %v1703_v35 = vld [vmem:[%s2379_s12] ss:$0 sm:$0xff] }
 0x342   : > { %1198 = vrot.lane.b32.xlu0 %v1191_v39, %s2018_s16  ;;  %1200 = vrot.lane.b32.xlu1 %v1194_v40, %s2019_s25  ;;  %v1197_v34 = vpack.i.b16 %v1196_v42, %v1195_v41  ;;  %s1529_s16 = scalar_lea.sflag [#allocation3], %s571_s22  ;;  %s1933_s25 = scalar_lea.vmem %s2321_s0, 128 }
 0x343   : > { %p1934_p12 = scmp.ne.s32.totalorder %s2321_s0, %s1933_s25  ;;  %p1941_p2 = scmp.lt.s32.totalorder %s1939_s17, %s1933_s25 }
 0x345   : > { %p1935_p13 = pnand %p1934_p12, %p2142_p4  ;;  %p1942_p3 = por %p1941_p2, %p1940_p1 }
 0x346   : > { %1202 = vrot.lane.b32.xlu1 %v1197_v34, %s2020_s27 }
 0x347   : > { %p1936_p0 = pneg %p1935_p13 }
 0x349   : > { %p1943_p5 = pnand %p1942_p3, %p1936_p0 }
 0x3b4   : > { %v1199_v43 = vpop.permute.xlu0 %1198  ;;  %v1201_v44 = vpop.permute.xlu1 %1200 }
 0x3b5   : > { %v1206_v45 = vsel %vm618_vm1, %v1188_v38, %v1199_v43 }
 0x3b6   : > { %v1209_v46 = vsel %vm1207_vm3, %v1206_v45, %v1201_v44 }
 0x3b8   : > { %v1203_v47 = vpop.permute.xlu1 %1202 }
 0x3b9   : > { %v1212_v48 = vsel %vm1210_vm4, %v1209_v46, %v1203_v47 }
 0x3ba   : > { %1805 = vmatmul.mubr.msk.bf16.vlgmr.msra.gmra.mrb[8].mxu0 %vm1236_vm5, %v1212_v48 }
 0x3bb   : > { %1832 = vmatprep.mubr.msk.bf16.mxu0 %vm2014_vm0, %v2013_v0  ;;  %1817 = vmatpush3.bf16.msra.mxu0 %v1903_v2 }
 0x3bc   : > { %1818 = vmatprep.subr.bf16.mxu0 %v2013_v0 }
 0x3bf   : > { %1819 = vmatpush3.bf16.msra.mxu0 %v1904_v13 }
 0x3c0   : > { %1820 = vmatprep.subr.bf16.mxu0 %v2013_v0 }
 0x3c3   : > { %1821 = vmatpush3.bf16.msra.mxu0 %v1905_v14 }
 0x3c4   : > { %1822 = vmatprep.subr.bf16.mxu0 %v2013_v0 }
 0x3c7   : > { %1823 = vmatpush3.bf16.msra.mxu0 %v1906_v15 }
 0x3c8   : > { %1824 = vmatprep.subr.bf16.mxu0 %v2013_v0 }
 0x3cb   : > { %1825 = vmatpush3.bf16.msra.mxu0 %v1907_v16 }
 0x3cc   : > { %1826 = vmatprep.subr.bf16.mxu0 %v2013_v0 }
 0x3cf   : > { %1827 = vmatpush3.bf16.msra.mxu0 %v1908_v17 }
 0x3d0   : > { %1828 = vmatprep.subr.bf16.mxu0 %v2013_v0 }
 0x3d3   : > { %1829 = vmatpush3.bf16.msra.mxu0 %v1909_v18 }
 0x3d4   : > { %1830 = vmatprep.subr.bf16.mxu0 %v2013_v0 }
 0x3d7   : > { %1831 = vmatpush3.bf16.msra.mxu0 %v1910_v19 }
 0x48d   : > { %v1273_v51 = vpop.f32.mrb[8].mxu0 }
 0x48e   : > { %v1274_v52 = vadd.f32 %v1693_v49, %v1273_v51  ;;  %v1806_v53 = vpop.f32.mrb[9].mxu0  ;;  %v1712_v51 = vld [vmem:[%s2380_s13] ss:$0 sm:$0xff] }
 0x48f   : > { %v1276_v54 = vpop.f32.mrb[10].mxu0  ;;  %v1713_v53 = vld [vmem:[%s2381_s14] ss:$0 sm:$0xff] }
 0x490   : > { %v2248_v55 = vadd.f32 %v1274_v52, %v604_v50  ;;  %v1807_v56 = vpop.f32.mrb[11].mxu0 }
 0x492   : > { %v1282_v57 = vsel %vm1236_vm5, %v2248_v55, 0.0 }
 0x493   : > { %1283 = vadd.xlane.f32.xlu1 %v1282_v57 }
 0x520   : > { %v1284_v58 = vpop.xlane.xlu1 %1283 }
 0x521   : > { %v1286_v59 = vmul.f32 0.03125, %v1284_v58 }
 0x523   : > { %v1287_v60 = vsub.f32 %v2248_v55, %v1286_v59 }
 0x525   : > { %v1288_v61 = vmul.f32 %v1287_v60, %v1287_v60 }
 0x527   : > { %v1289_v62 = vsel %vm1236_vm5, %v1288_v61, 0.0 }
 0x528   : > { %1290 = vadd.xlane.f32.xlu0 %v1289_v62 }
 0x5b5   : > { %v1291_v3 = vpop.xlane.xlu0 %1290 }
 0x5b6   : > { %v1292_v4 = vmul.f32 0.03125, %v1291_v3 }
 0x5b8   : > { %v1293_v5 = vadd.f32 1e-05, %v1292_v4 }
 0x5ba   : > { %1927 = vrsqrt.f32 %v1293_v5 }
 0x5c4   : > { %v1928_v6 = vpop.eup %1927 }
 0x5c5   : > { %v1295_v8 = vmul.f32 %v1928_v6, %v1287_v60 }
 0x5c7   : > { %v1302_v10 = vmul.f32 %v1697_v7, %v1295_v8 }
 0x5c9   : > { %v1309_v11 = vadd.f32 %v1698_v9, %v1302_v10 }
 0x5cb   : > { %v1310_v12 = vpack.c.bf16 %v1309_v11, %v1309_v11 }
 0x5cd   : > { %1813 = vmatmul.mubr.msk.bf16.vlgmr.msra.gmra.mrb[24].mxu1 %vm1236_vm5, %v1310_v12 }
 0x6a0   : > { %v1371_v21 = vpop.f32.mrb[24].mxu1 }
 0x6a1   : > { %v1372_v22 = vadd.f32 %v1699_v20, %v1371_v21  ;;  %v1814_v23 = vpop.f32.mrb[25].mxu1 }
 0x6a2   : > { %v1374_v24 = vpop.f32.mrb[26].mxu1 }
 0x6a3   : > { %v1377_v25 = vmul.f32 %v1372_v22, %v1372_v22  ;;  %v1815_v26 = vpop.f32.mrb[27].mxu1  ;;  %v1378_v30 = vmul.f32 0.5, %v1372_v22 }
 0x6a5   : > { %v1379_v27 = vmul.f32 0.035677407, %v1377_v25 }
 0x6a7   : > { %v1380_v28 = vadd.f32 0.7978846, %v1379_v27 }
 0x6a9   : > { %v1381_v29 = vmul.f32 %v1380_v28, %v1372_v22 }
 0x6ab   : > { %1929 = vtanh.f32 %v1381_v29 }
 0x6b5   : > { %v1930_v0 = vpop.eup %1929 }
 0x6b6   : > { %v1383_v31 = vadd.f32 1.0, %v1930_v0 }
 0x6b8   : > { %v1384_v32 = vmul.f32 %v1383_v31, %v1378_v30 }
 0x6ba   : > { %v1385_v33 = vpack.c.bf16 %v1384_v32, %v1384_v32 }
 0x6bc   : > { %1833 = vmatmul.mubr.bf16.vlgmr.msra.gmra.mrb[12].mxu0 %v1385_v33 }
 0x78f   : > { %v1491_v36 = vpop.f32.mrb[12].mxu0 }
 0x790   : > { %v1492_v37 = vadd.f32 %v1703_v35, %v1491_v36  ;;  %v1834_v38 = vpop.f32.mrb[13].mxu0 }
 0x791   : > { %v1494_v39 = vpop.f32.mrb[14].mxu0 }
 0x792   : > { %v1835_v40 = vpop.f32.mrb[15].mxu0  ;;  %v1497_v41 = vadd.f32 %v1492_v37, %v2248_v55 }
 0x794   : > { %v1500_v42 = vsel %vm1236_vm5, %v1497_v41, 0.0 }
 0x795   : > { %1501 = vadd.xlane.f32.xlu0 %v1500_v42 }
 0x822   : > { %v1502_v34 = vpop.xlane.xlu0 %1501 }
 0x823   : > { %v1503_v43 = vmul.f32 0.03125, %v1502_v34 }
 0x825   : > { %v1504_v44 = vsub.f32 %v1497_v41, %v1503_v43 }
 0x827   : > { %v1505_v45 = vmul.f32 %v1504_v44, %v1504_v44 }
 0x829   : > { %v1506_v46 = vsel %vm1236_vm5, %v1505_v45, 0.0 }
 0x82a   : > { %1507 = vadd.xlane.f32.xlu0 %v1506_v46 }
 0x8b7   : > { %v1508_v47 = vpop.xlane.xlu0 %1507 }
 0x8b8   : > { %v1509_v48 = vmul.f32 0.03125, %v1508_v47 }
 0x8ba   : > { %v1510_v49 = vadd.f32 1e-05, %v1509_v48 }
 0x8bc   : > { %1931 = vrsqrt.f32 %v1510_v49 }
 0x8c6   : > { %v1932_v50 = vpop.eup %1931 }
 0x8c7   : > { %v1512_v52 = vmul.f32 %v1932_v50, %v1504_v44 }
 0x8c9   : > { %v1519_v54 = vmul.f32 %v1712_v51, %v1512_v52 }
 0x8cb   : > { %v1526_v55 = vadd.f32 %v1713_v53, %v1519_v54 }
 0x8cd   : > { %1527 = vst.msk [vmem:[%s573_s29] sm:$0xff] %vm1236_vm5, %v1526_v55 }
 0x8ce   : > { %1946 = shalt.err (!%p1943_p5)
}
 0x8cf   : > { %s1947_s1 = scalar_lea.hbm %s2319_s3, 128  ;;  %s1951_s27 = scalar_lea.hbm %s2382_s15, 256 }
 0x8d0   : > { %p1948_p6 = scmp.ne.s32.totalorder %s2319_s3, %s1947_s1  ;;  %p1952_p10 = scmp.lt.u32.totalorder %s2319_s3, %s2382_s15 }
 0x8d1   : > { %p1953_p11 = scmp.lt.u32.totalorder %s1951_s27, %s1947_s1  ;;  %p1955_p13 = scmp.lt.u32.totalorder %s1947_s1, %s2319_s3 }
 0x8d2   : > { %p1949_p7 = pnand %p1948_p6, %p2142_p4 }
 0x8d3   : > { %p1954_p12 = por %p1953_p11, %p1952_p10 }
 0x8d4   : > { %p1950_p9 = pneg %p1949_p7 }
 0x8d5   : > { %p1956_p0 = por %p1955_p13, %p1954_p12 }
 0x8d7   : > { %p1957_p1 = pnand %p1956_p0, %p1950_p9 }
 0x8d9   : > { %1960 = shalt.err (!%p1957_p1)
}
 0x8da   : > { %1836 = dma.vmem_to_hbm [thread:$0]  (%p2142_p4), %s2321_s0, 128, %s2319_s3, %s1529_s16  }
 0x8db PF: > { %p1842_p2 = scmp.ge.s32.totalorder %s2011_s23, 2  ;;  %s1555_s25 = sand.u32 1, %s1991_s18  }
 0x8dc   : > { %s1556_s21 = scalar_lea.sflag [#allocation3], %s1555_s25 }
 0x8dd   : > { %p1839_p3 = pnand %p1842_p2, %p2149_p8 }
 0x8df   : > { %1986 = dma.done.wait (!%p1839_p3), %s1556_s21, 128  }
 0x8e0   : > { %1988 = vsyncadd (!%p1839_p3), %s1556_s21, 4294967168  ;;  %s28_s23 = sadd.s32 1, %s2011_s23   ;;  %s2398_s28 = sld [smem:[#allocation7_spill]] }
 0x8e1   : > { %p25_p5 = scmp.ge.s32.totalorder %s28_s23, 4   ;;  %s2399_s21 = sld [smem:[#allocation5_spill]] }
 0x8e2   : > { %s2400_s22 = sld [smem:[#allocation6_spill]]  ;;  %s2401_s18 = smov %s1995_s19 }
 0x8e3   : > { %s2402_s19 = smov %s1999_s20  ;;  %27 = sbr.rel (!%p25_p5) target bundleno = 9 (0x9), region = 127 }
 0x8e6   : > { %s2403_s20 = smov %s2398_s28 }
 0x8ea   :  { %1561 = vsyncpa [#allocation3], 1 }
 0x8eb   :  { %1563 = vsyncpa [#allocation3 + $0x1], 1 }

// kernel: msk_forward.13
= control target key start
LH: loop header
LB: loop body
LE: loop exit
PB: predicated region body
PF: predicated region fallthrough
CT: control target
= control target key end

     0   :  { %s1910_s25 = smov 0   ;;  %s1912_s26 = smov 0   ;;  %s2092_s0 = inlined_call_operand.vmem [shape: f32[2,8,32], index: 0, kind: input, shape index: {}]   ;;  %s2093_s1 = inlined_call_operand.vmem [shape: bf16[2,4,8,8], index: 1, kind: input, shape index: {}]   ;;  %s2094_s2 = inlined_call_operand.vmem [shape: bf16[2,4,8,8], index: 2, kind: input, shape index: {}]   ;;  %s2095_s3 = inlined_call_operand.vmem [shape: bf16[2,4,8,8], index: 3, kind: input, shape index: {}]   ;;  %s2096_s4 = inlined_call_operand.vmem [shape: f32[8,8], index: 4, kind: input, shape index: {}]   ;;  %s2097_s5 = inlined_call_operand.vmem [shape: bf16[32,32], index: 5, kind: input, shape index: {}]   ;;  %s2098_s6 = inlined_call_operand.vmem [shape: f32[1,32], index: 6, kind: input, shape index: {}]   ;;  %s2099_s7 = inlined_call_operand.vmem [shape: f32[1,32], index: 7, kind: input, shape index: {}]   ;;  %s2100_s8 = inlined_call_operand.vmem [shape: f32[1,32], index: 8, kind: input, shape index: {}]   ;;  %s2101_s9 = inlined_call_operand.vmem [shape: bf16[32,128], index: 9, kind: input, shape index: {}]   ;;  %s2102_s10 = inlined_call_operand.vmem [shape: f32[1,128], index: 10, kind: input, shape index: {}]   ;;  %s2103_s11 = inlined_call_operand.vmem [shape: bf16[128,32], index: 11, kind: input, shape index: {}]   ;;  %s2104_s12 = inlined_call_operand.vmem [shape: f32[1,32], index: 12, kind: input, shape index: {}]   ;;  %s2105_s13 = inlined_call_operand.vmem [shape: f32[2,8,32], index: 13, kind: output, shape index: {}]  }
   0x1   :  { %s1914_s27 = smov 0  }
   0x2 LB: > { %s35_s28 = sadd.s32 1, %s1826_s26  ;;  %p1588_p0 = scmp.ge.s32.totalorder %s1830_s27, 1  ;;  %s1830_s27 = sphi %s1914_s27, %s23_s27   ;;  %s1826_s26 = sphi %s1912_s26, %s2107_s26   ;;  %s1822_s25 = sphi %s1910_s25, %s2106_s25  }
   0x3   : > { %p37_p1 = scmp.ge.s32.totalorder %s35_s28, 2  ;;  %p449_p2 = scmp.lt.s32.totalorder %s1830_s27, 3 }
   0x5   : > { %s2109_s28 = smov (%p37_p1, %s35_s28), 0  ;;  %p450_p3 = pnand %p1588_p0, %p449_p2 }
   0x6   : > { %p519_p4 = scmp.lt.s32.totalorder (!%p450_p3), %s1822_s25, 1  ;;  %v1832_v0 = vmov (!%p450_p3), 0.0   ;;  %vm1833_vm0 = vmmov (!%p450_p3), 0   ;;  %vm570_vm1 = vcmask (!%p450_p3), 64512   ;;  %v569_v13 = vld [vmem:[%s2096_s4] sm:$0xff] (!%p450_p3)  ;;  %vm806_vm2 = vcmask (!%p450_p3), 1043456  }
   0x7   : > { %453 = sbr.rel (%p450_p3) target bundleno = 1926 (0x786), region = 72  ;;  %1660 = vmatprep.subr.bf16.mxu1 (!%p450_p3), %v1832_v0  ;;  %1662 = vmatprep.mubr.msk.bf16.mxu1 (!%p450_p3), %vm1833_vm0, %v1832_v0  ;;  %s1838_s16 = smov (!%p450_p3), 16   ;;  %vm1159_vm3 = vcmask (!%p450_p3), 130048   ;;  %vm1162_vm4 = vcmask (!%p450_p3), 195584   ;;  %vm1188_vm5 = vcmask (!%p450_p3), 261120  }
   0x8   : > { %1684 = vmatprep.subr.bf16.mxu0 (!%p450_p3), %v1832_v0  ;;  %1686 = vmatprep.mubr.msk.bf16.mxu0 (!%p450_p3), %vm1833_vm0, %v1832_v0  ;;  %s1839_s17 = smov (!%p450_p3), 24  }
   0xe   : > { %s2111_s25 = smov (!%p519_p4, %s1822_s25), 1 }
   0xf   : > { %s1937_s29 = sshll.u32 %s2111_s25, 4 }
  0x10   : > { %s538_s15 = scalar_lea.vmem %s2094_s2, %s1937_s29  ;;  %s533_s18 = scalar_lea.vmem %s2093_s1, %s1937_s29 }
  0x11   : > { %v561_v1 = vld [vmem:[%s538_s15] sm:$0xf]  ;;  %v562_v3 = vld [vmem:[%s538_s15 + $0x4] sm:$0xf]  ;;  %v563_v6 = vld [vmem:[%s538_s15 + $0x8] sm:$0xf]  ;;  %s543_s23 = scalar_lea.vmem %s2095_s3, %s1937_s29 }
  0x12   : > { %v575_v2 = vsel %vm570_vm1, %v561_v1, 0  ;;  %v557_v4 = vld [vmem:[%s533_s18] sm:$0xf]  ;;  %v621_v5 = vsel %vm570_vm1, %v562_v3, 0  ;;  %v558_v7 = vld [vmem:[%s533_s18 + $0x4] sm:$0xf] }
  0x13   : > { %1661 = vmatpush3.bf16.xpose.msra.mxu1 %v575_v2  ;;  %v667_v8 = vsel %vm570_vm1, %v563_v6, 0  ;;  %v564_v9 = vld [vmem:[%s538_s15 + $0xc] sm:$0xf]  ;;  %v559_v10 = vld [vmem:[%s533_s18 + $0x8] sm:$0xf]  ;;  %s1837_s15 = smov 8  }
  0x14   : > { %1666 = vmatprep.subr.bf16.mxu1 %v1832_v0  ;;  %v713_v11 = vsel %vm570_vm1, %v564_v9, 0  ;;  %v560_v12 = vld [vmem:[%s533_s18 + $0xc] sm:$0xf]  ;;  %v565_v58 = vld [vmem:[%s543_s23] sm:$0xf]  ;;  %s1589_s18 = sshll.u32 %s2111_s25, 3 }
  0x15   : > { %v808_v59 = vsel %vm806_vm2, %v565_v58, 0  ;;  %v566_v60 = vld [vmem:[%s543_s23 + $0x4] sm:$0xf]  ;;  %v567_v62 = vld [vmem:[%s543_s23 + $0x8] sm:$0xf]  ;;  %s525_s21 = scalar_lea.vmem %s2092_s0, %s1589_s18 }
  0x16   : > { %1685 = vmatpush3.bf16.msra.mxu0 %v808_v59  ;;  %v854_v61 = vsel %vm806_vm2, %v566_v60, 0  ;;  %v900_v63 = vsel %vm806_vm2, %v567_v62, 0  ;;  %v568_v1 = vld [vmem:[%s543_s23 + $0xc] sm:$0xf]  ;;  %v1836_v60 = vmov 0  }
  0x17   : > { %1696 = vmatprep.subr.bf16.mxu0 %v1832_v0  ;;  %v946_v2 = vsel %vm806_vm2, %v568_v1, 0 }
  0x1a   : > { %1663 = vmatmul.mubr.msk.bf16.vlgmr.msra.gmra.mrb[0].mxu1 %vm570_vm1, %v557_v4 }
  0x1b   : > { %1667 = vmatpush3.bf16.xpose.msra.mxu1 %v621_v5  ;;  %1668 = vmatprep.mubr.msk.bf16.mxu1 %vm1833_vm0, %v1832_v0 }
  0x1c   : > { %1672 = vmatprep.subr.bf16.mxu1 %v1832_v0 }
  0x22   : > { %1669 = vmatmul.mubr.msk.bf16.vlgmr.msra.gmra.mrb[4].mxu1 %vm570_vm1, %v558_v7 }
  0x23   : > { %1673 = vmatpush3.bf16.xpose.msra.mxu1 %v667_v8  ;;  %1674 = vmatprep.mubr.msk.bf16.mxu1 %vm1833_vm0, %v1832_v0 }
  0x24   : > { %1678 = vmatprep.subr.bf16.mxu1 %v1832_v0 }
  0x2a   : > { %1675 = vmatmul.mubr.msk.bf16.vlgmr.msra.gmra.mrb[8].mxu1 %vm570_vm1, %v559_v10 }
  0x2b   : > { %1679 = vmatpush3.bf16.xpose.msra.mxu1 %v713_v11  ;;  %1680 = vmatprep.mubr.msk.bf16.mxu1 %vm1833_vm0, %v1832_v0 }
  0x2c   : > { %1690 = vmatprep.subr.bf16.mxu1 %v1832_v0 }
  0x32   : > { %1681 = vmatmul.mubr.msk.bf16.vlgmr.msra.gmra.mrb[12].mxu1 %vm570_vm1, %v560_v12 }
  0x33   : > { %1692 = vmatprep.mubr.msk.bf16.mxu1 %vm1833_vm0, %v1832_v0  ;;  %1691 = vmatpush3.bf16.msra.mxu1 %v854_v61 }
  0x34   : > { %1702 = vmatprep.subr.bf16.mxu1 %v1832_v0 }
  0xed   : > { %v611_v14 = vpop.f32.mrb[0].mxu1 }
  0xee   : > { %v612_v15 = vadd.f32 %v611_v14, %v569_v13  ;;  %v1664_v16 = vpop.f32.mrb[1].mxu1 }
  0xef   : > { %v614_v17 = vpop.f32.mrb[2].mxu1 }
  0xf0   : > { %v1665_v18 = vpop.f32.mrb[3].mxu1  ;;  %v755_v19 = vsel %vm570_vm1, %v612_v15, -inf }
  0xf1   : > { %756 = vmax.xlane.f32.xlu0 %v755_v19  ;;  %v1776_v19 = vld [vmem:[%s2097_s5] sm:$0xff]  }
  0xf5   : > { %v657_v20 = vpop.f32.mrb[4].mxu1 }
  0xf6   : > { %v658_v21 = vadd.f32 %v657_v20, %v569_v13  ;;  %v1670_v22 = vpop.f32.mrb[5].mxu1 }
  0xf7   : > { %v660_v23 = vpop.f32.mrb[6].mxu1 }
  0xf8   : > { %v1671_v24 = vpop.f32.mrb[7].mxu1  ;;  %v758_v25 = vsel %vm570_vm1, %v658_v21, -inf }
  0xf9   : > { %759 = vmax.xlane.f32.xlu0 %v758_v25  ;;  %v1834_v24 = vmov 1983009808  }
  0xfa   : > { %v990_v25 = vunpack.c.l.s4 %v1834_v24 }
  0xfd   : > { %v703_v26 = vpop.f32.mrb[8].mxu1 }
  0xfe   : > { %v704_v27 = vadd.f32 %v703_v26, %v569_v13  ;;  %v1676_v28 = vpop.f32.mrb[9].mxu1  ;;  %v992_v26 = vlaneseq }
  0xff   : > { %v706_v29 = vpop.f32.mrb[10].mxu1 }
 0x100   : > { %v1677_v30 = vpop.f32.mrb[11].mxu1  ;;  %v761_v31 = vsel %vm570_vm1, %v704_v27, -inf }
 0x101   : > { %762 = vmax.xlane.f32.xlu1 %v761_v31  ;;  %v991_v30 = vunpack.c.0.s8 %v990_v25  ;;  %v993_v31 = vshrl.u32 %v992_v26, 7  ;;  %v1777_v25 = vld [vmem:[%s2097_s5 + $0x8] sm:$0xff]  }
 0x105   : > { %v749_v32 = vpop.f32.mrb[12].mxu1 }
 0x106   : > { %v750_v33 = vadd.f32 %v749_v32, %v569_v13  ;;  %v1682_v34 = vpop.f32.mrb[13].mxu1 }
 0x107   : > { %v752_v35 = vpop.f32.mrb[14].mxu1  ;;  %v994_v34 = vsub.s32 %v991_v30, %v993_v31 }
 0x108   : > { %v1683_v36 = vpop.f32.mrb[15].mxu1  ;;  %v764_v37 = vsel %vm570_vm1, %v750_v33, -inf  ;;  %v1835_v35 = vmov 1934713408  }
 0x109   : > { %765 = vmax.xlane.f32.xlu1 %v764_v37  ;;  %v1007_v36 = vunpack.c.l.s4 %v1835_v35 }
 0x17e   : > { %v757_v38 = vpop.xlane.xlu0 %756 }
 0x17f   : > { %v767_v39 = vsub.f32 %v612_v15, %v757_v38 }
 0x181   : > { %v771_v40 = vmul.f32 1.442695, %v767_v39 }
 0x183   : > { %1788 = vpow2.f32 %v771_v40 }
 0x186   : > { %v760_v41 = vpop.xlane.xlu0 %759 }
 0x187   : > { %v768_v42 = vsub.f32 %v658_v21, %v760_v41 }
 0x189   : > { %v773_v43 = vmul.f32 1.442695, %v768_v42 }
 0x18b   : > { %1790 = vpow2.f32 %v773_v43  ;;  %v1008_v43 = vunpack.c.0.s8 %v1007_v36 }
 0x18d   : > { %v1789_v44 = vpop.eup %1788 }
 0x18e   : > { %v763_v45 = vpop.xlane.xlu1 %762  ;;  %v779_v46 = vsel %vm570_vm1, %v1789_v44, 0.0 }
 0x18f   : > { %v769_v47 = vsub.f32 %v704_v27, %v763_v45  ;;  %780 = vadd.xlane.f32.xlu0 %v779_v46 }
 0x191   : > { %v775_v48 = vmul.f32 1.442695, %v769_v47  ;;  %v1011_v47 = vsub.s32 %v1008_v43, %v993_v31 }
 0x193   : > { %1792 = vpow2.f32 %v775_v48 }
 0x195   : > { %v1791_v49 = vpop.eup %1790 }
 0x196   : > { %v766_v50 = vpop.xlane.xlu1 %765  ;;  %v782_v51 = vsel %vm570_vm1, %v1791_v49, 0.0 }
 0x197   : > { %v770_v52 = vsub.f32 %v750_v33, %v766_v50  ;;  %783 = vadd.xlane.f32.xlu1 %v782_v51 }
 0x199   : > { %v777_v53 = vmul.f32 1.442695, %v770_v52 }
 0x19b   : > { %1794 = vpow2.f32 %v777_v53 }
 0x19d   : > { %v1793_v54 = vpop.eup %1792 }
 0x19e   : > { %v785_v55 = vsel %vm570_vm1, %v1793_v54, 0.0 }
 0x19f   : > { %786 = vadd.xlane.f32.xlu0 %v785_v55 }
 0x1a5   : > { %v1795_v56 = vpop.eup %1794 }
 0x1a6   : > { %v788_v57 = vsel %vm570_vm1, %v1795_v56, 0.0 }
 0x1a7   : > { %789 = vadd.xlane.f32.xlu1 %v788_v57 }
 0x21c   : > { %v781_v3 = vpop.xlane.xlu0 %780 }
 0x21d   : > { %1796 = vrcp.f32 %v781_v3 }
 0x224   : > { %v784_v4 = vpop.xlane.xlu1 %783 }
 0x225   : > { %1798 = vrcp.f32 %v784_v4 }
 0x227   : > { %v1797_v5 = vpop.eup %1796 }
 0x228   : > { %v795_v6 = vmul.f32 %v1797_v5, %v1789_v44 }
 0x22a   : > { %v799_v7 = vpack.c.bf16 %v795_v6, %v795_v6 }
 0x22c   : > { %1687 = vmatmul.mubr.msk.bf16.vlgmr.msra.gmra.mrb[0].mxu0 %vm570_vm1, %v799_v7  ;;  %v787_v8 = vpop.xlane.xlu0 %786 }
 0x22d   : > { %1800 = vrcp.f32 %v787_v8  ;;  %1697 = vmatpush3.bf16.msra.mxu0 %v900_v63  ;;  %1698 = vmatprep.mubr.msk.bf16.mxu0 %vm1833_vm0, %v1832_v0 }
 0x22e   : > { %1708 = vmatprep.subr.bf16.mxu0 %v1832_v0 }
 0x22f   : > { %v1799_v9 = vpop.eup %1798 }
 0x230   : > { %v796_v10 = vmul.f32 %v1799_v9, %v1791_v49 }
 0x232   : > { %v800_v11 = vpack.c.bf16 %v796_v10, %v796_v10 }
 0x234   : > { %1693 = vmatmul.mubr.msk.bf16.vlgmr.msra.gmra.mrb[16].mxu1 %vm570_vm1, %v800_v11  ;;  %v790_v12 = vpop.xlane.xlu1 %789 }
 0x235   : > { %1802 = vrcp.f32 %v790_v12  ;;  %1703 = vmatpush3.bf16.msra.mxu1 %v946_v2  ;;  %1704 = vmatprep.mubr.msk.bf16.mxu1 %vm1833_vm0, %v1832_v0 }
 0x236   : > { %1716 = vmatprep.subr.bf16.mxu1 %v1832_v0 }
 0x237   : > { %v1801_v13 = vpop.eup %1800 }
 0x238   : > { %v797_v14 = vmul.f32 %v1801_v13, %v1793_v54 }
 0x23a   : > { %v801_v15 = vpack.c.bf16 %v797_v14, %v797_v14 }
 0x23c   : > { %1699 = vmatmul.mubr.msk.bf16.vlgmr.msra.gmra.mrb[4].mxu0 %vm570_vm1, %v801_v15 }
 0x23d   : > { %1712 = vmatprep.mubr.msk.bf16.mxu0 %vm1833_vm0, %v1832_v0  ;;  %1709 = vmatpush3.bf16.msra.mxu0 %v1776_v19 }
 0x23e   : > { %1710 = vmatprep.subr.bf16.mxu0 %v1832_v0 }
 0x23f   : > { %v1803_v16 = vpop.eup %1802 }
 0x240   : > { %v798_v17 = vmul.f32 %v1803_v16, %v1795_v56 }
 0x241   : > { %1711 = vmatpush3.bf16.msra.mxu0 %v1777_v25 }
 0x242   : > { %v802_v18 = vpack.c.bf16 %v798_v17, %v798_v17  ;;  %1724 = vmatprep.subr.bf16.mxu0 %v1832_v0 }
 0x244   : > { %1705 = vmatmul.mubr.msk.bf16.vlgmr.msra.gmra.mrb[20].mxu1 %vm570_vm1, %v802_v18 }
 0x245   : > { %1720 = vmatprep.mubr.msk.bf16.mxu1 %vm1833_vm0, %v1832_v0 }
 0x2ff   : > { %v844_v20 = vpop.f32.mrb[0].mxu0 }
 0x300   : > { %v1688_v21 = vpop.f32.mrb[1].mxu0  ;;  %v988_v33 = vpack.c.bf16 %v844_v20, %v844_v20 }
 0x301   : > { %v847_v22 = vpop.f32.mrb[2].mxu0 }
 0x302   : > { %v1689_v23 = vpop.f32.mrb[3].mxu0  ;;  %v995_v41 = vrot.slane %v988_v33, %v994_v34 }
 0x307   : > { %v890_v27 = vpop.f32.mrb[16].mxu1 }
 0x308   : > { %v1694_v28 = vpop.f32.mrb[17].mxu1  ;;  %v1022_v48 = vpack.c.bf16 %v890_v27, %v890_v27 }
 0x309   : > { %v893_v29 = vpop.f32.mrb[18].mxu1 }
 0x30a   : > { %v1695_v32 = vpop.f32.mrb[19].mxu1  ;;  %v1029_v55 = vrot.slane %v1022_v48, %v994_v34 }
 0x30f   : > { %v936_v37 = vpop.f32.mrb[4].mxu0 }
 0x310   : > { %v996_v38 = vpack.c.bf16 %v936_v37, %v936_v37  ;;  %v1700_v39 = vpop.f32.mrb[5].mxu0 }
 0x311   : > { %v939_v40 = vpop.f32.mrb[6].mxu0 }
 0x312   : > { %v1003_v42 = vrot.slane %v996_v38, %v994_v34  ;;  %v1701_v44 = vpop.f32.mrb[7].mxu0 }
 0x314   : > { %v1004_v45 = vcombine.low %v995_v41, %v1003_v42  ;;  %v1005_v46 = vcombine.high %v995_v41, %v1003_v42 }
 0x316   : > { %v1012_v53 = vrot.slane %v1004_v45, %v1011_v47  ;;  %v1019_v57 = vrot.slane %v1005_v46, %v1011_v47 }
 0x317   : > { %v982_v49 = vpop.f32.mrb[20].mxu1 }
 0x318   : > { %v1706_v50 = vpop.f32.mrb[21].mxu1  ;;  %v1030_v51 = vpack.c.bf16 %v982_v49, %v982_v49  ;;  %v1020_v61 = vcombine.high %v1012_v53, %v1836_v60  ;;  %v1021_v1 = vcombine.high %v1019_v57, %v1836_v60  ;;  %v1060_v2 = vshrl.u32 %v1012_v53, 16  ;;  %v1605_v49 = vld [vmem:[%s2098_s6] ss:$0 sm:$0xff] }
 0x319   : > { %v985_v52 = vpop.f32.mrb[22].mxu1  ;;  %v1076_v8 = vshrl.u32 %v1019_v57, 16  ;;  %v556_v50 = vld [vmem:[%s525_s21] sm:$0xff] }
 0x31a   : > { %v1707_v54 = vpop.f32.mrb[23].mxu1  ;;  %v1037_v56 = vrot.slane %v1030_v51, %v994_v34  ;;  %v1068_v7 = vshrl.u32 %v1020_v61, 16  ;;  %v1084_v15 = vshrl.u32 %v1021_v1, 16 }
 0x31c   : > { %v1038_v58 = vcombine.low %v1029_v55, %v1037_v56  ;;  %v1039_v59 = vcombine.high %v1029_v55, %v1037_v56 }
 0x31e   : > { %v1046_v62 = vrot.slane %v1038_v58, %v1011_v47  ;;  %v1053_v63 = vrot.slane %v1039_v59, %v1011_v47 }
 0x320   : > { %v1054_v3 = vcombine.high %v1046_v62, %v1836_v60  ;;  %v1055_v4 = vcombine.high %v1053_v63, %v1836_v60  ;;  %v1058_v5 = vpack.i.b16 %v1046_v62, %v1012_v53  ;;  %v1061_v6 = vshrl.u32 %v1046_v62, 16 }
 0x321   : > { %v1074_v9 = vpack.i.b16 %v1053_v63, %v1019_v57  ;;  %v1077_v10 = vshrl.u32 %v1053_v63, 16  ;;  %v1778_v63 = vld [vmem:[%s2101_s9] sm:$0xff]  }
 0x322   : > { %v1062_v11 = vpack.i.b16 %v1061_v6, %v1060_v2  ;;  %v1066_v12 = vpack.i.b16 %v1054_v3, %v1020_v61  ;;  %v1069_v13 = vshrl.u32 %v1054_v3, 16  ;;  %v1082_v14 = vpack.i.b16 %v1055_v4, %v1021_v1  ;;  %1717 = vmatpush3.bf16.msra.mxu1 %v1778_v63  ;;  %v1779_v1 = vld [vmem:[%s2101_s9 + $0x8] sm:$0xff]   ;;  %v1780_v2 = vld [vmem:[%s2103_s11] sm:$0xff]  }
 0x323   : > { %v1078_v16 = vpack.i.b16 %v1077_v10, %v1076_v8  ;;  %v1085_v17 = vshrl.u32 %v1055_v4, 16  ;;  %v1088_v18 = vcombine.low %v1058_v5, %v1074_v9  ;;  %1718 = vmatprep.subr.bf16.mxu1 %v1832_v0  ;;  %v1610_v9 = vld [vmem:[%s2100_s8] ss:$0 sm:$0xff] }
 0x324   : > { %v1070_v19 = vpack.i.b16 %v1069_v13, %v1068_v7  ;;  %v1096_v20 = vcombine.low %v1066_v12, %v1082_v14  ;;  %v1609_v7 = vld [vmem:[%s2099_s7] ss:$0 sm:$0xff]  ;;  %v1781_v13 = vld [vmem:[%s2103_s11 + $0x8] sm:$0xff]   ;;  %v1782_v14 = vld [vmem:[%s2103_s11 + $0x10] sm:$0xff]  }
 0x325   : > { %v1086_v21 = vpack.i.b16 %v1085_v17, %v1084_v15  ;;  %v1113_v22 = vcombine.low %v1062_v11, %v1078_v16  ;;  %v1095_v23 = vrot.slane %v1088_v18, %v994_v34  ;;  %v1783_v15 = vld [vmem:[%s2103_s11 + $0x18] sm:$0xff]   ;;  %v1784_v16 = vld [vmem:[%s2103_s11 + $0x20] sm:$0xff]   ;;  %v1785_v17 = vld [vmem:[%s2103_s11 + $0x28] sm:$0xff]  }
 0x326   : > { %v1103_v24 = vrot.slane %v1096_v20, %v994_v34  ;;  %1719 = vmatpush3.bf16.msra.mxu1 %v1779_v1  ;;  %v1786_v18 = vld [vmem:[%s2103_s11 + $0x30] sm:$0xff]   ;;  %v1611_v20 = vld [vmem:[%s2102_s10] ss:$0 sm:$0xff] }
 0x327   : > { %v1121_v26 = vcombine.low %v1070_v19, %v1086_v21  ;;  %v1120_v28 = vrot.slane %v1113_v22, %v994_v34  ;;  %v1787_v19 = vld [vmem:[%s2103_s11 + $0x38] sm:$0xff]  }
 0x328   : > { %v1104_v27 = vcombine.low %v1095_v23, %v1103_v24 }
 0x329   : > { %v1128_v29 = vrot.slane %v1121_v26, %v994_v34 }
 0x32a   : > { %v1111_v30 = vrot.slane %v1104_v27, %v1011_v47 }
 0x32b   : > { %v1129_v31 = vcombine.low %v1120_v28, %v1128_v29 }
 0x32c   : > { %v1112_v33 = vcombine.high %v1111_v30, %v1836_v60  ;;  %v1141_v35 = vshrl.u32 %v1111_v30, 16 }
 0x32d   : > { %v1136_v32 = vrot.slane %v1129_v31, %v1011_v47 }
 0x32e   : > { %v1147_v41 = vshrl.u32 %v1112_v33, 16 }
 0x32f   : > { %v1142_v36 = vshrl.u32 %v1136_v32, 16  ;;  %v1137_v37 = vcombine.high %v1136_v32, %v1836_v60  ;;  %v1140_v38 = vpack.i.b16 %v1136_v32, %v1111_v30 }
 0x331   : > { %v1143_v39 = vpack.i.b16 %v1142_v36, %v1141_v35  ;;  %v1146_v40 = vpack.i.b16 %v1137_v37, %v1112_v33  ;;  %v1148_v42 = vshrl.u32 %v1137_v37, 16  ;;  %v1615_v35 = vld [vmem:[%s2104_s12] ss:$0 sm:$0xff] }
 0x333   : > { %1150 = vrot.lane.b32.xlu0 %v1143_v39, %s1837_s15  ;;  %1152 = vrot.lane.b32.xlu1 %v1146_v40, %s1838_s16  ;;  %v1149_v34 = vpack.i.b16 %v1148_v42, %v1147_v41 }
 0x337   : > { %1154 = vrot.lane.b32.xlu1 %v1149_v34, %s1839_s17  ;;  %s554_s17 = scalar_lea.vmem %s2105_s13, %s1589_s18 }
 0x3a5   : > { %v1151_v43 = vpop.permute.xlu0 %1150  ;;  %v1153_v44 = vpop.permute.xlu1 %1152 }
 0x3a6   : > { %v1158_v45 = vsel %vm570_vm1, %v1140_v38, %v1151_v43 }
 0x3a7   : > { %v1161_v46 = vsel %vm1159_vm3, %v1158_v45, %v1153_v44 }
 0x3a9   : > { %v1155_v47 = vpop.permute.xlu1 %1154 }
 0x3aa   : > { %v1164_v48 = vsel %vm1162_vm4, %v1161_v46, %v1155_v47 }
 0x3ab   : > { %1713 = vmatmul.mubr.msk.bf16.vlgmr.msra.gmra.mrb[8].mxu0 %vm1188_vm5, %v1164_v48 }
 0x3ac   : > { %1740 = vmatprep.mubr.msk.bf16.mxu0 %vm1833_vm0, %v1832_v0  ;;  %1725 = vmatpush3.bf16.msra.mxu0 %v1780_v2 }
 0x3ad   : > { %1726 = vmatprep.subr.bf16.mxu0 %v1832_v0 }
 0x3b0   : > { %1727 = vmatpush3.bf16.msra.mxu0 %v1781_v13 }
 0x3b1   : > { %1728 = vmatprep.subr.bf16.mxu0 %v1832_v0 }
 0x3b4   : > { %1729 = vmatpush3.bf16.msra.mxu0 %v1782_v14 }
 0x3b5   : > { %1730 = vmatprep.subr.bf16.mxu0 %v1832_v0 }
 0x3b8   : > { %1731 = vmatpush3.bf16.msra.mxu0 %v1783_v15 }
 0x3b9   : > { %1732 = vmatprep.subr.bf16.mxu0 %v1832_v0 }
 0x3bc   : > { %1733 = vmatpush3.bf16.msra.mxu0 %v1784_v16 }
 0x3bd   : > { %1734 = vmatprep.subr.bf16.mxu0 %v1832_v0 }
 0x3c0   : > { %1735 = vmatpush3.bf16.msra.mxu0 %v1785_v17 }
 0x3c1   : > { %1736 = vmatprep.subr.bf16.mxu0 %v1832_v0 }
 0x3c4   : > { %1737 = vmatpush3.bf16.msra.mxu0 %v1786_v18 }
 0x3c5   : > { %1738 = vmatprep.subr.bf16.mxu0 %v1832_v0 }
 0x3c8   : > { %1739 = vmatpush3.bf16.msra.mxu0 %v1787_v19 }
 0x47e   : > { %v1225_v51 = vpop.f32.mrb[8].mxu0 }
 0x47f   : > { %v1226_v52 = vadd.f32 %v1605_v49, %v1225_v51  ;;  %v1714_v53 = vpop.f32.mrb[9].mxu0 }
 0x480   : > { %v1228_v54 = vpop.f32.mrb[10].mxu0 }
 0x481   : > { %v2019_v55 = vadd.f32 %v1226_v52, %v556_v50  ;;  %v1715_v56 = vpop.f32.mrb[11].mxu0 }
 0x483   : > { %v1234_v57 = vsel %vm1188_vm5, %v2019_v55, 0.0 }
 0x484   : > { %1235 = vadd.xlane.f32.xlu1 %v1234_v57 }
 0x511   : > { %v1236_v58 = vpop.xlane.xlu1 %1235 }
 0x512   : > { %v1238_v59 = vmul.f32 0.03125, %v1236_v58 }
 0x514   : > { %v1239_v60 = vsub.f32 %v2019_v55, %v1238_v59 }
 0x516   : > { %v1240_v61 = vmul.f32 %v1239_v60, %v1239_v60 }
 0x518   : > { %v1241_v62 = vsel %vm1188_vm5, %v1240_v61, 0.0 }
 0x519   : > { %1242 = vadd.xlane.f32.xlu0 %v1241_v62 }
 0x5a6   : > { %v1243_v3 = vpop.xlane.xlu0 %1242 }
 0x5a7   : > { %v1244_v4 = vmul.f32 0.03125, %v1243_v3 }
 0x5a9   : > { %v1245_v5 = vadd.f32 1e-05, %v1244_v4 }
 0x5ab   : > { %1804 = vrsqrt.f32 %v1245_v5 }
 0x5b5   : > { %v1805_v6 = vpop.eup %1804 }
 0x5b6   : > { %v1247_v8 = vmul.f32 %v1805_v6, %v1239_v60 }
 0x5b8   : > { %v1254_v10 = vmul.f32 %v1609_v7, %v1247_v8 }
 0x5ba   : > { %v1261_v11 = vadd.f32 %v1610_v9, %v1254_v10 }
 0x5bc   : > { %v1262_v12 = vpack.c.bf16 %v1261_v11, %v1261_v11 }
 0x5be   : > { %1721 = vmatmul.mubr.msk.bf16.vlgmr.msra.gmra.mrb[24].mxu1 %vm1188_vm5, %v1262_v12 }
 0x691   : > { %v1323_v21 = vpop.f32.mrb[24].mxu1 }
 0x692   : > { %v1324_v22 = vadd.f32 %v1611_v20, %v1323_v21  ;;  %v1722_v23 = vpop.f32.mrb[25].mxu1 }
 0x693   : > { %v1326_v24 = vpop.f32.mrb[26].mxu1 }
 0x694   : > { %v1329_v25 = vmul.f32 %v1324_v22, %v1324_v22  ;;  %v1723_v26 = vpop.f32.mrb[27].mxu1  ;;  %v1330_v30 = vmul.f32 0.5, %v1324_v22 }
 0x696   : > { %v1331_v27 = vmul.f32 0.035677407, %v1329_v25 }
 0x698   : > { %v1332_v28 = vadd.f32 0.7978846, %v1331_v27 }
 0x69a   : > { %v1333_v29 = vmul.f32 %v1332_v28, %v1324_v22 }
 0x69c   : > { %1806 = vtanh.f32 %v1333_v29 }
 0x6a6   : > { %v1807_v0 = vpop.eup %1806 }
 0x6a7   : > { %v1335_v31 = vadd.f32 1.0, %v1807_v0 }
 0x6a9   : > { %v1336_v32 = vmul.f32 %v1335_v31, %v1330_v30 }
 0x6ab   : > { %v1337_v33 = vpack.c.bf16 %v1336_v32, %v1336_v32 }
 0x6ad   : > { %1741 = vmatmul.mubr.bf16.vlgmr.msra.gmra.mrb[12].mxu0 %v1337_v33 }
 0x780   : > { %v1443_v36 = vpop.f32.mrb[12].mxu0 }
 0x781   : > { %v1444_v37 = vadd.f32 %v1615_v35, %v1443_v36  ;;  %v1742_v38 = vpop.f32.mrb[13].mxu0 }
 0x782   : > { %v1446_v39 = vpop.f32.mrb[14].mxu0 }
 0x783   : > { %v1449_v40 = vadd.f32 %v1444_v37, %v2019_v55  ;;  %v1743_v41 = vpop.f32.mrb[15].mxu0 }
 0x785   : > { %1450 = vst.msk [vmem:[%s554_s17] sm:$0xff] %vm1188_vm5, %v1449_v40 }
 0x786 PF: > { %s23_s27 = sadd.s32 1, %s1830_s27   ;;  %s2106_s25 = smov %s1826_s26 }
 0x787   : > { %p20_p5 = scmp.ge.s32.totalorder %s23_s27, 4   ;;  %s2107_s26 = smov %s2109_s28 }
 0x789   :  { %22 = sbr.rel (!%p20_p5) target bundleno = 2 (0x2), region = 114 }

</bundles_post_ra>
